<compile_context>
chip_gen: v5e
topology: v5e:2x2
jax: 0.10.0
libtpu: 0.0.40
codegen_flags: <defaults>
</compile_context>

<pallas_src>
import functools

import jax
import jax.numpy as jnp
from jax.experimental import pallas as pl
from jax.experimental.pallas import tpu as pltpu


# ----------------------------- Fused Pallas kernel -----------------------------

def _fused_sgnn_kernel(*refs, S, nf, ef, V):
    (ei_rows_ref, ei_cols_ref, f_flat_ref, s_ref, edge_f_ref, edge_s_ref,
     es_w1, es_b1, es_w2, es_b2, es_w3, es_b3,
     sm_w1, sm_b1, sm_w2, sm_b2, sm_w3, sm_b3,
     em_w1, em_b1, em_w2, em_b2, em_w3, em_b3,
     sf_w1, sf_b1, sf_w2, sf_b2, sf_w3, sf_b3,
     edge_f_w_ref, f_mlp_w_ref,
     f_out_ref, s_out_ref) = refs

    N = f_flat_ref.shape[0]
    E = edge_f_ref.shape[0]

    def mlp(x, w1, b1, w2, b2, w3, b3):
        # BaseMLP: Linear -> ReLU -> Linear -> ReLU -> Linear
        h = jnp.dot(x, w1[...], preferred_element_type=jnp.float32) + b1[...]
        h = jnp.maximum(h, 0.0)
        h = jnp.dot(h, w2[...], preferred_element_type=jnp.float32) + b2[...]
        h = jnp.maximum(h, 0.0)
        return jnp.dot(h, w3[...], preferred_element_type=jnp.float32) + b3[...]

    # --- gather / scatter operators built in VMEM (no HBM one-hot) ---
    ei_rows = ei_rows_ref[...]                                    # (2, E) int32
    ei_cols = ei_cols_ref[...]                                    # (E, 2) int32
    iota_ne = jax.lax.broadcasted_iota(jnp.int32, (N, E), 0)
    iota_en = jax.lax.broadcasted_iota(jnp.int32, (E, N), 1)
    scat = (iota_ne == ei_rows[0:1, :]).astype(jnp.float32)       # (N, E) scatter to edge_index[0]
    g_src = (iota_en == ei_cols[:, 0:1]).astype(jnp.float32)      # (E, N) gather edge_index[0]
    g_dst = (iota_en == ei_cols[:, 1:2]).astype(jnp.float32)      # (E, N) gather edge_index[1]

    # counts computed ONCE; pre-normalize rows so each scatter-mean is one matmul
    counts = jnp.sum(scat, axis=1, keepdims=True)                 # (N, 1)
    inv_counts = 1.0 / jnp.maximum(counts, 1.0)
    scat_mean = scat * inv_counts                                 # (N, E)

    # --- gathers as MXU matmuls ---
    s_all = s_ref[...]                                            # (N, ns)
    s_src = jnp.dot(g_src, s_all, preferred_element_type=jnp.float32)   # (E, ns)
    s_dst = jnp.dot(g_dst, s_all, preferred_element_type=jnp.float32)   # (E, ns)

    f_flat = f_flat_ref[...]                                      # (N, S*nf)
    f_src = jnp.dot(g_src, f_flat, preferred_element_type=jnp.float32)  # (E, S*nf)
    f_dst = jnp.dot(g_dst, f_flat, preferred_element_type=jnp.float32)  # (E, S*nf)
    edge_f_flat = edge_f_ref[...]                                 # (E, S*ef)

    # --- edge scalar MLP + scatter-mean ---
    s_in = jnp.concatenate([s_src, s_dst, edge_s_ref[...]], axis=-1)     # (E, 2*ns+es)
    _s = mlp(s_in, es_w1, es_b1, es_w2, es_b2, es_w3, es_b3)             # (E, H)
    s_c = jnp.dot(scat_mean, _s, preferred_element_type=jnp.float32)     # (N, H)

    # --- per-node gram f^T f on the VPU, emitted lane-packed (N, nf*nf) ---
    f_s_blocks = [f_flat[:, k * nf:(k + 1) * nf] for k in range(S)]      # S x (N, nf)
    gram_cols = []
    for i in range(nf):
        acc = f_s_blocks[0][:, i:i + 1] * f_s_blocks[0]
        for k in range(1, S):
            acc = acc + f_s_blocks[k][:, i:i + 1] * f_s_blocks[k]
        gram_cols.append(acc)                                            # (N, nf)
    f2s = jnp.concatenate(gram_cols, axis=-1)                            # (N, nf*nf)

    # --- node scalar update ---
    temp_s = jnp.concatenate([s_all, s_c, f2s], axis=-1)                 # (N, 2H+nf*nf)
    s_out_ref[...] = mlp(temp_s, sm_w1, sm_b1, sm_w2, sm_b2, sm_w3, sm_b3)

    # --- edge vector features, gating, scatter-mean ---
    edge_f_w = edge_f_w_ref[...]                                         # (2nf+ef, V)
    gate_e = mlp(_s, em_w1, em_b1, em_w2, em_b2, em_w3, em_b3)           # (E, V)
    fg_blocks = []
    for k in range(S):
        x = jnp.concatenate([f_src[:, k * nf:(k + 1) * nf],
                             f_dst[:, k * nf:(k + 1) * nf],
                             edge_f_flat[:, k * ef:(k + 1) * ef]], axis=-1)   # (E, 2nf+ef)
        fk = jnp.dot(x, edge_f_w, preferred_element_type=jnp.float32)    # (E, V)
        fg_blocks.append(gate_e * fk)
    fg_flat = jnp.concatenate(fg_blocks, axis=-1)                        # (E, S*V)
    f_c_flat = jnp.dot(scat_mean, fg_flat, preferred_element_type=jnp.float32)  # (N, S*V)

    # --- node vector update (lane-dense (N, S*V) output slab) ---
    f_mlp_w = f_mlp_w_ref[...]                                           # (nf+V, V)
    gate_n = mlp(temp_s, sf_w1, sf_b1, sf_w2, sf_b2, sf_w3, sf_b3)       # (N, V)
    out_blocks = []
    for k in range(S):
        tf = jnp.concatenate([f_s_blocks[k],
                              f_c_flat[:, k * V:(k + 1) * V]], axis=-1)  # (N, nf+V)
        lin = jnp.dot(tf, f_mlp_w, preferred_element_type=jnp.float32)   # (N, V)
        out_blocks.append(gate_n * lin)
    f_out_ref[...] = jnp.concatenate(out_blocks, axis=-1)                # (N, S*V)


# ----------------------------- Wrapper -----------------------------

def sgnn_forward(params, f, s, edge_index, edge_f, edge_s):
    N, S, nf = f.shape
    E = edge_index.shape[1]
    ef = edge_f.shape[-1]
    ns = s.shape[-1]
    es = edge_s.shape[-1]
    V = params["edge_f_w"].shape[1]
    H = params["edge_s"]["w3"].shape[1]

    # Free XLA layout plumbing only; all math happens inside the single kernel.
    ei_rows = edge_index.astype(jnp.int32)                 # (2, E)
    ei_cols = ei_rows.T                                    # (E, 2)
    f_flat = f.reshape(N, S * nf)                          # (N, S*nf)
    edge_f_flat = edge_f.reshape(E, S * ef)                # (E, S*ef)

    args = [ei_rows, ei_cols, f_flat, s, edge_f_flat, edge_s]
    for name in ("edge_s", "s_mlp", "edge_mlp", "sf_mlp"):
        p = params[name]
        args += [p["w1"], p["b1"], p["w2"], p["b2"], p["w3"], p["b3"]]
    args += [params["edge_f_w"], params["f_mlp_w"]]

    mlp_flops = lambda rows, din, dh, dout: 2 * rows * (din * dh + dh * dh + dh * dout)
    flops = (
        2 * E * N * (2 * ns + 2 * S * nf)            # one-hot gathers
        + mlp_flops(E, 2 * ns + es, H, H)            # edge_s MLP
        + 2 * N * E * (H + S * V)                    # two scatter-means
        + 2 * N * S * nf * nf                        # gram
        + mlp_flops(N, 2 * H + nf * nf, H, H)        # s_mlp
        + mlp_flops(E, H, H, V)                      # edge_mlp
        + mlp_flops(N, 2 * H + nf * nf, H, V)        # sf_mlp
        + 2 * E * S * (2 * nf + ef) * V              # edge_f linear
        + 2 * N * S * (nf + V) * V                   # f_mlp linear
    )
    bytes_accessed = 4 * (sum(int(a.size) for a in args) + N * S * V + N * H)

    vmem = lambda: pl.BlockSpec(memory_space=pltpu.MemorySpace.VMEM)
    f_out_flat, s_out = pl.pallas_call(
        functools.partial(_fused_sgnn_kernel, S=S, nf=nf, ef=ef, V=V),
        out_shape=(jax.ShapeDtypeStruct((N, S * V), jnp.float32),
                   jax.ShapeDtypeStruct((N, H), jnp.float32)),
        in_specs=[vmem() for _ in args],
        out_specs=(vmem(), vmem()),
        cost_estimate=pl.CostEstimate(flops=flops, transcendentals=0,
                                      bytes_accessed=bytes_accessed),
    )(*args)

    return f_out_flat.reshape(N, S, V), s_out


# ----------------------------- Parameter init -----------------------------

def _init_linear(key, din, dout, bias=True):
    kw, kb = jax.random.split(key)
    scale = 1.0 / jnp.sqrt(din)
    w = jax.random.uniform(kw, (din, dout), jnp.float32, -scale, scale)
    if not bias:
        return w
    b = jax.random.uniform(kb, (1, dout), jnp.float32, -scale, scale)
    return w, b


def _init_mlp(key, din, dh, dout):
    k1, k2, k3 = jax.random.split(key, 3)
    w1, b1 = _init_linear(k1, din, dh)
    w2, b2 = _init_linear(k2, dh, dh)
    w3, b3 = _init_linear(k3, dh, dout)
    return dict(w1=w1, b1=b1, w2=w2, b2=b2, w3=w3, b3=b3)


def init_sgnn_params(key, node_f_dim, node_s_dim, edge_f_dim, edge_s_dim,
                     hidden_dim, vector_dim):
    ks = jax.random.split(key, 6)
    return dict(
        edge_s=_init_mlp(ks[0], node_s_dim * 2 + edge_s_dim, hidden_dim, hidden_dim),
        s_mlp=_init_mlp(ks[1], hidden_dim * 2 + vector_dim * vector_dim, hidden_dim, hidden_dim),
        edge_mlp=_init_mlp(ks[2], hidden_dim, hidden_dim, vector_dim),
        sf_mlp=_init_mlp(ks[3], hidden_dim * 2 + vector_dim * vector_dim, hidden_dim, vector_dim),
        edge_f_w=_init_linear(ks[4], node_f_dim * 2 + edge_f_dim, vector_dim, bias=False),
        f_mlp_w=_init_linear(ks[5], node_f_dim + vector_dim, vector_dim, bias=False),
    )


# ----------------------------- Pure-JAX reference -----------------------------

def _ref_forward(params, f, s, edge_index, edge_f, edge_s):
    relu = lambda x: jnp.maximum(x, 0.0)

    def mlp(p, x):
        h = relu(x @ p["w1"] + p["b1"][0])
        h = relu(h @ p["w2"] + p["b2"][0])
        return h @ p["w3"] + p["b3"][0]

    ei0, ei1 = edge_index[0], edge_index[1]
    N = f.shape[0]
    _s = jnp.concatenate([s[ei0], s[ei1], edge_s], -1)
    _f = jnp.concatenate([f[ei0], f[ei1], edge_f], -1) @ params["edge_f_w"]
    _s = mlp(params["edge_s"], _s)
    counts = jnp.maximum(jax.ops.segment_sum(jnp.ones_like(ei0, jnp.float32), ei0, N), 1.0)
    s_c = jax.ops.segment_sum(_s, ei0, N) / counts[:, None]
    f2s = jnp.einsum("nsi,nsj->nij", f, f).reshape(N, -1)
    temp_s = jnp.concatenate([s, s_c, f2s], -1)
    s_out = mlp(params["s_mlp"], temp_s)
    _fg = mlp(params["edge_mlp"], _s)[:, None, :] * _f
    f_c = jax.ops.segment_sum(_fg, ei0, N) / counts[:, None, None]
    temp_f = jnp.concatenate([f, f_c], -1)
    f_out = mlp(params["sf_mlp"], temp_s)[:, None, :] * (temp_f @ params["f_mlp_w"])
    return f_out, s_out


# ----------------------------- Main -----------------------------

if __name__ == "__main__":
    # Small, consistent shapes: node_s_dim == hidden_dim, node_f_dim == vector_dim
    N, E, S = 16, 32, 3
    node_f_dim = vector_dim = 4
    node_s_dim = hidden_dim = 32
    edge_f_dim = 4
    edge_s_dim = 8

    key = jax.random.PRNGKey(0)
    kp, kf, ks, ke, kef, kes = jax.random.split(key, 6)

    params = init_sgnn_params(kp, node_f_dim, node_s_dim, edge_f_dim, edge_s_dim,
                              hidden_dim, vector_dim)

    f = jax.random.normal(kf, (N, S, node_f_dim), jnp.float32)
    s = jax.random.normal(ks, (N, node_s_dim), jnp.float32)
    edge_index = jax.random.randint(ke, (2, E), 0, N, jnp.int32)
    edge_f = jax.random.normal(kef, (E, S, edge_f_dim), jnp.float32)
    edge_s = jax.random.normal(kes, (E, edge_s_dim), jnp.float32)

    f_out, s_out = sgnn_forward(params, f, s, edge_index, edge_f, edge_s)
    jax.block_until_ready((f_out, s_out))

    f_ref, s_ref = _ref_forward(params, f, s, edge_index, edge_f, edge_s)
    assert f_out.shape == (N, S, vector_dim) and s_out.shape == (N, hidden_dim)
    assert jnp.allclose(f_out, f_ref, atol=1e-4, rtol=1e-4)
    assert jnp.allclose(s_out, s_ref, atol=1e-4, rtol=1e-4)

    print("KERNEL_OK")
</pallas_src>

<mosaic_0001>
module attributes {stable_mosaic.version = 11 : i64} {
  func.func @_fused_sgnn_kernel(%arg0: memref<2x32xi32, #tpu.memory_space<vmem>>, %arg1: memref<32x2xi32, #tpu.memory_space<vmem>>, %arg2: memref<16x12xf32, #tpu.memory_space<vmem>>, %arg3: memref<16x32xf32, #tpu.memory_space<vmem>>, %arg4: memref<32x12xf32, #tpu.memory_space<vmem>>, %arg5: memref<32x8xf32, #tpu.memory_space<vmem>>, %arg6: memref<72x32xf32, #tpu.memory_space<vmem>>, %arg7: memref<1x32xf32, #tpu.memory_space<vmem>>, %arg8: memref<32x32xf32, #tpu.memory_space<vmem>>, %arg9: memref<1x32xf32, #tpu.memory_space<vmem>>, %arg10: memref<32x32xf32, #tpu.memory_space<vmem>>, %arg11: memref<1x32xf32, #tpu.memory_space<vmem>>, %arg12: memref<80x32xf32, #tpu.memory_space<vmem>>, %arg13: memref<1x32xf32, #tpu.memory_space<vmem>>, %arg14: memref<32x32xf32, #tpu.memory_space<vmem>>, %arg15: memref<1x32xf32, #tpu.memory_space<vmem>>, %arg16: memref<32x32xf32, #tpu.memory_space<vmem>>, %arg17: memref<1x32xf32, #tpu.memory_space<vmem>>, %arg18: memref<32x32xf32, #tpu.memory_space<vmem>>, %arg19: memref<1x32xf32, #tpu.memory_space<vmem>>, %arg20: memref<32x32xf32, #tpu.memory_space<vmem>>, %arg21: memref<1x32xf32, #tpu.memory_space<vmem>>, %arg22: memref<32x4xf32, #tpu.memory_space<vmem>>, %arg23: memref<1x4xf32, #tpu.memory_space<vmem>>, %arg24: memref<80x32xf32, #tpu.memory_space<vmem>>, %arg25: memref<1x32xf32, #tpu.memory_space<vmem>>, %arg26: memref<32x32xf32, #tpu.memory_space<vmem>>, %arg27: memref<1x32xf32, #tpu.memory_space<vmem>>, %arg28: memref<32x4xf32, #tpu.memory_space<vmem>>, %arg29: memref<1x4xf32, #tpu.memory_space<vmem>>, %arg30: memref<12x4xf32, #tpu.memory_space<vmem>>, %arg31: memref<8x4xf32, #tpu.memory_space<vmem>>, %arg32: memref<16x12xf32, #tpu.memory_space<vmem>>, %arg33: memref<16x32xf32, #tpu.memory_space<vmem>>) attributes {dimension_semantics = [], scalar_prefetch = 0 : i64, scratch_operands = 0 : i64, tpu.core_type = #tpu.core_type<tc>} {
    %c0 = arith.constant 0 : index
    %c0_0 = arith.constant 0 : index
    %0 = vector.load %arg0[%c0, %c0_0] : memref<2x32xi32, #tpu.memory_space<vmem>>, vector<2x32xi32>
    %c0_1 = arith.constant 0 : index
    %c0_2 = arith.constant 0 : index
    %1 = vector.load %arg1[%c0_1, %c0_2] : memref<32x2xi32, #tpu.memory_space<vmem>>, vector<32x2xi32>
    %2 = tpu.iota {dimensions = array<i32: 0>} : vector<16x32xi32>
    %3 = tpu.iota {dimensions = array<i32: 1>} : vector<32x16xi32>
    %4 = vector.extract_strided_slice %0 {offsets = [0, 0], sizes = [1, 32], strides = [1, 1]} : vector<2x32xi32> to vector<1x32xi32>
    %5 = vector.broadcast %4 : vector<1x32xi32> to vector<16x32xi32>
    %6 = arith.cmpi eq, %2, %5 : vector<16x32xi32>
    %7 = arith.extui %6 : vector<16x32xi1> to vector<16x32xi32>
    %8 = arith.sitofp %7 : vector<16x32xi32> to vector<16x32xf32>
    %9 = vector.extract_strided_slice %1 {offsets = [0, 0], sizes = [32, 1], strides = [1, 1]} : vector<32x2xi32> to vector<32x1xi32>
    %10 = vector.broadcast %9 : vector<32x1xi32> to vector<32x16xi32>
    %11 = arith.cmpi eq, %3, %10 : vector<32x16xi32>
    %12 = arith.extui %11 : vector<32x16xi1> to vector<32x16xi32>
    %13 = arith.sitofp %12 : vector<32x16xi32> to vector<32x16xf32>
    %14 = vector.extract_strided_slice %1 {offsets = [0, 1], sizes = [32, 1], strides = [1, 1]} : vector<32x2xi32> to vector<32x1xi32>
    %15 = vector.broadcast %14 : vector<32x1xi32> to vector<32x16xi32>
    %16 = arith.cmpi eq, %3, %15 : vector<32x16xi32>
    %17 = arith.extui %16 : vector<32x16xi1> to vector<32x16xi32>
    %18 = arith.sitofp %17 : vector<32x16xi32> to vector<32x16xf32>
    %cst = arith.constant dense<0.000000e+00> : vector<16xf32>
    %19 = vector.multi_reduction <add>, %8, %cst [1] : vector<16x32xf32> to vector<16xf32>
    %20 = vector.shape_cast %19 : vector<16xf32> to vector<16x1xf32>
    %cst_3 = arith.constant 1.000000e+00 : f32
    %21 = vector.broadcast %cst_3 : f32 to vector<16x1xf32>
    %22 = arith.maximumf %20, %21 : vector<16x1xf32>
    %cst_4 = arith.constant 1.000000e+00 : f32
    %23 = vector.broadcast %cst_4 : f32 to vector<16x1xf32>
    %24 = arith.divf %23, %22 : vector<16x1xf32>
    %25 = vector.broadcast %24 : vector<16x1xf32> to vector<16x32xf32>
    %26 = arith.mulf %8, %25 : vector<16x32xf32>
    %c0_5 = arith.constant 0 : index
    %c0_6 = arith.constant 0 : index
    %27 = vector.load %arg3[%c0_5, %c0_6] : memref<16x32xf32, #tpu.memory_space<vmem>>, vector<16x32xf32>
    %cst_7 = arith.constant dense<0.000000e+00> : vector<32x32xf32>
    %28 = tpu.matmul %13, %27, %cst_7 {dimension_numbers = #tpu.dot_dimension_numbers<[1], [0], [0], [1], [0, 0, 1, 1], [], []>} : vector<32x16xf32>, vector<16x32xf32>, vector<32x32xf32> -> vector<32x32xf32>
    %cst_8 = arith.constant dense<0.000000e+00> : vector<32x32xf32>
    %29 = tpu.matmul %18, %27, %cst_8 {dimension_numbers = #tpu.dot_dimension_numbers<[1], [0], [0], [1], [0, 0, 1, 1], [], []>} : vector<32x16xf32>, vector<16x32xf32>, vector<32x32xf32> -> vector<32x32xf32>
    %c0_9 = arith.constant 0 : index
    %c0_10 = arith.constant 0 : index
    %30 = vector.load %arg2[%c0_9, %c0_10] : memref<16x12xf32, #tpu.memory_space<vmem>>, vector<16x12xf32>
    %cst_11 = arith.constant dense<0.000000e+00> : vector<32x12xf32>
    %31 = tpu.matmul %13, %30, %cst_11 {dimension_numbers = #tpu.dot_dimension_numbers<[1], [0], [0], [1], [0, 0, 1, 1], [], []>} : vector<32x16xf32>, vector<16x12xf32>, vector<32x12xf32> -> vector<32x12xf32>
    %cst_12 = arith.constant dense<0.000000e+00> : vector<32x12xf32>
    %32 = tpu.matmul %18, %30, %cst_12 {dimension_numbers = #tpu.dot_dimension_numbers<[1], [0], [0], [1], [0, 0, 1, 1], [], []>} : vector<32x16xf32>, vector<16x12xf32>, vector<32x12xf32> -> vector<32x12xf32>
    %c0_13 = arith.constant 0 : index
    %c0_14 = arith.constant 0 : index
    %33 = vector.load %arg4[%c0_13, %c0_14] : memref<32x12xf32, #tpu.memory_space<vmem>>, vector<32x12xf32>
    %c0_15 = arith.constant 0 : index
    %c0_16 = arith.constant 0 : index
    %34 = vector.load %arg5[%c0_15, %c0_16] : memref<32x8xf32, #tpu.memory_space<vmem>>, vector<32x8xf32>
    %35 = tpu.concatenate %28, %29, %34 in 1 : vector<32x32xf32>, vector<32x32xf32>, vector<32x8xf32> -> vector<32x72xf32>
    %c0_17 = arith.constant 0 : index
    %c0_18 = arith.constant 0 : index
    %36 = vector.load %arg6[%c0_17, %c0_18] : memref<72x32xf32, #tpu.memory_space<vmem>>, vector<72x32xf32>
    %cst_19 = arith.constant dense<0.000000e+00> : vector<32x32xf32>
    %37 = tpu.matmul %35, %36, %cst_19 {dimension_numbers = #tpu.dot_dimension_numbers<[1], [0], [0], [1], [0, 0, 1, 1], [], []>} : vector<32x72xf32>, vector<72x32xf32>, vector<32x32xf32> -> vector<32x32xf32>
    %c0_20 = arith.constant 0 : index
    %c0_21 = arith.constant 0 : index
    %38 = vector.load %arg7[%c0_20, %c0_21] : memref<1x32xf32, #tpu.memory_space<vmem>>, vector<1x32xf32>
    %39 = vector.broadcast %38 : vector<1x32xf32> to vector<32x32xf32>
    %40 = arith.addf %37, %39 : vector<32x32xf32>
    %cst_22 = arith.constant 0.000000e+00 : f32
    %41 = vector.broadcast %cst_22 : f32 to vector<32x32xf32>
    %42 = arith.maximumf %40, %41 : vector<32x32xf32>
    %c0_23 = arith.constant 0 : index
    %c0_24 = arith.constant 0 : index
    %43 = vector.load %arg8[%c0_23, %c0_24] : memref<32x32xf32, #tpu.memory_space<vmem>>, vector<32x32xf32>
    %cst_25 = arith.constant dense<0.000000e+00> : vector<32x32xf32>
    %44 = tpu.matmul %42, %43, %cst_25 {dimension_numbers = #tpu.dot_dimension_numbers<[1], [0], [0], [1], [0, 0, 1, 1], [], []>} : vector<32x32xf32>, vector<32x32xf32>, vector<32x32xf32> -> vector<32x32xf32>
    %c0_26 = arith.constant 0 : index
    %c0_27 = arith.constant 0 : index
    %45 = vector.load %arg9[%c0_26, %c0_27] : memref<1x32xf32, #tpu.memory_space<vmem>>, vector<1x32xf32>
    %46 = vector.broadcast %45 : vector<1x32xf32> to vector<32x32xf32>
    %47 = arith.addf %44, %46 : vector<32x32xf32>
    %cst_28 = arith.constant 0.000000e+00 : f32
    %48 = vector.broadcast %cst_28 : f32 to vector<32x32xf32>
    %49 = arith.maximumf %47, %48 : vector<32x32xf32>
    %c0_29 = arith.constant 0 : index
    %c0_30 = arith.constant 0 : index
    %50 = vector.load %arg10[%c0_29, %c0_30] : memref<32x32xf32, #tpu.memory_space<vmem>>, vector<32x32xf32>
    %cst_31 = arith.constant dense<0.000000e+00> : vector<32x32xf32>
    %51 = tpu.matmul %49, %50, %cst_31 {dimension_numbers = #tpu.dot_dimension_numbers<[1], [0], [0], [1], [0, 0, 1, 1], [], []>} : vector<32x32xf32>, vector<32x32xf32>, vector<32x32xf32> -> vector<32x32xf32>
    %c0_32 = arith.constant 0 : index
    %c0_33 = arith.constant 0 : index
    %52 = vector.load %arg11[%c0_32, %c0_33] : memref<1x32xf32, #tpu.memory_space<vmem>>, vector<1x32xf32>
    %53 = vector.broadcast %52 : vector<1x32xf32> to vector<32x32xf32>
    %54 = arith.addf %51, %53 : vector<32x32xf32>
    %cst_34 = arith.constant dense<0.000000e+00> : vector<16x32xf32>
    %55 = tpu.matmul %26, %54, %cst_34 {dimension_numbers = #tpu.dot_dimension_numbers<[1], [0], [0], [1], [0, 0, 1, 1], [], []>} : vector<16x32xf32>, vector<32x32xf32>, vector<16x32xf32> -> vector<16x32xf32>
    %56 = vector.extract_strided_slice %30 {offsets = [0, 0], sizes = [16, 4], strides = [1, 1]} : vector<16x12xf32> to vector<16x4xf32>
    %57 = vector.extract_strided_slice %30 {offsets = [0, 4], sizes = [16, 4], strides = [1, 1]} : vector<16x12xf32> to vector<16x4xf32>
    %58 = vector.extract_strided_slice %30 {offsets = [0, 8], sizes = [16, 4], strides = [1, 1]} : vector<16x12xf32> to vector<16x4xf32>
    %59 = vector.extract_strided_slice %56 {offsets = [0, 0], sizes = [16, 1], strides = [1, 1]} : vector<16x4xf32> to vector<16x1xf32>
    %60 = vector.broadcast %59 : vector<16x1xf32> to vector<16x4xf32>
    %61 = arith.mulf %60, %56 : vector<16x4xf32>
    %62 = vector.extract_strided_slice %57 {offsets = [0, 0], sizes = [16, 1], strides = [1, 1]} : vector<16x4xf32> to vector<16x1xf32>
    %63 = vector.broadcast %62 : vector<16x1xf32> to vector<16x4xf32>
    %64 = arith.mulf %63, %57 : vector<16x4xf32>
    %65 = arith.addf %61, %64 : vector<16x4xf32>
    %66 = vector.extract_strided_slice %58 {offsets = [0, 0], sizes = [16, 1], strides = [1, 1]} : vector<16x4xf32> to vector<16x1xf32>
    %67 = vector.broadcast %66 : vector<16x1xf32> to vector<16x4xf32>
    %68 = arith.mulf %67, %58 : vector<16x4xf32>
    %69 = arith.addf %65, %68 : vector<16x4xf32>
    %70 = vector.extract_strided_slice %56 {offsets = [0, 1], sizes = [16, 1], strides = [1, 1]} : vector<16x4xf32> to vector<16x1xf32>
    %71 = vector.broadcast %70 : vector<16x1xf32> to vector<16x4xf32>
    %72 = arith.mulf %71, %56 : vector<16x4xf32>
    %73 = vector.extract_strided_slice %57 {offsets = [0, 1], sizes = [16, 1], strides = [1, 1]} : vector<16x4xf32> to vector<16x1xf32>
    %74 = vector.broadcast %73 : vector<16x1xf32> to vector<16x4xf32>
    %75 = arith.mulf %74, %57 : vector<16x4xf32>
    %76 = arith.addf %72, %75 : vector<16x4xf32>
    %77 = vector.extract_strided_slice %58 {offsets = [0, 1], sizes = [16, 1], strides = [1, 1]} : vector<16x4xf32> to vector<16x1xf32>
    %78 = vector.broadcast %77 : vector<16x1xf32> to vector<16x4xf32>
    %79 = arith.mulf %78, %58 : vector<16x4xf32>
    %80 = arith.addf %76, %79 : vector<16x4xf32>
    %81 = vector.extract_strided_slice %56 {offsets = [0, 2], sizes = [16, 1], strides = [1, 1]} : vector<16x4xf32> to vector<16x1xf32>
    %82 = vector.broadcast %81 : vector<16x1xf32> to vector<16x4xf32>
    %83 = arith.mulf %82, %56 : vector<16x4xf32>
    %84 = vector.extract_strided_slice %57 {offsets = [0, 2], sizes = [16, 1], strides = [1, 1]} : vector<16x4xf32> to vector<16x1xf32>
    %85 = vector.broadcast %84 : vector<16x1xf32> to vector<16x4xf32>
    %86 = arith.mulf %85, %57 : vector<16x4xf32>
    %87 = arith.addf %83, %86 : vector<16x4xf32>
    %88 = vector.extract_strided_slice %58 {offsets = [0, 2], sizes = [16, 1], strides = [1, 1]} : vector<16x4xf32> to vector<16x1xf32>
    %89 = vector.broadcast %88 : vector<16x1xf32> to vector<16x4xf32>
    %90 = arith.mulf %89, %58 : vector<16x4xf32>
    %91 = arith.addf %87, %90 : vector<16x4xf32>
    %92 = vector.extract_strided_slice %56 {offsets = [0, 3], sizes = [16, 1], strides = [1, 1]} : vector<16x4xf32> to vector<16x1xf32>
    %93 = vector.broadcast %92 : vector<16x1xf32> to vector<16x4xf32>
    %94 = arith.mulf %93, %56 : vector<16x4xf32>
    %95 = vector.extract_strided_slice %57 {offsets = [0, 3], sizes = [16, 1], strides = [1, 1]} : vector<16x4xf32> to vector<16x1xf32>
    %96 = vector.broadcast %95 : vector<16x1xf32> to vector<16x4xf32>
    %97 = arith.mulf %96, %57 : vector<16x4xf32>
    %98 = arith.addf %94, %97 : vector<16x4xf32>
    %99 = vector.extract_strided_slice %58 {offsets = [0, 3], sizes = [16, 1], strides = [1, 1]} : vector<16x4xf32> to vector<16x1xf32>
    %100 = vector.broadcast %99 : vector<16x1xf32> to vector<16x4xf32>
    %101 = arith.mulf %100, %58 : vector<16x4xf32>
    %102 = arith.addf %98, %101 : vector<16x4xf32>
    %103 = tpu.concatenate %69, %80, %91, %102 in 1 : vector<16x4xf32>, vector<16x4xf32>, vector<16x4xf32>, vector<16x4xf32> -> vector<16x16xf32>
    %104 = tpu.concatenate %27, %55, %103 in 1 : vector<16x32xf32>, vector<16x32xf32>, vector<16x16xf32> -> vector<16x80xf32>
    %c0_35 = arith.constant 0 : index
    %c0_36 = arith.constant 0 : index
    %105 = vector.load %arg12[%c0_35, %c0_36] : memref<80x32xf32, #tpu.memory_space<vmem>>, vector<80x32xf32>
    %cst_37 = arith.constant dense<0.000000e+00> : vector<16x32xf32>
    %106 = tpu.matmul %104, %105, %cst_37 {dimension_numbers = #tpu.dot_dimension_numbers<[1], [0], [0], [1], [0, 0, 1, 1], [], []>} : vector<16x80xf32>, vector<80x32xf32>, vector<16x32xf32> -> vector<16x32xf32>
    %c0_38 = arith.constant 0 : index
    %c0_39 = arith.constant 0 : index
    %107 = vector.load %arg13[%c0_38, %c0_39] : memref<1x32xf32, #tpu.memory_space<vmem>>, vector<1x32xf32>
    %108 = vector.broadcast %107 : vector<1x32xf32> to vector<16x32xf32>
    %109 = arith.addf %106, %108 : vector<16x32xf32>
    %cst_40 = arith.constant 0.000000e+00 : f32
    %110 = vector.broadcast %cst_40 : f32 to vector<16x32xf32>
    %111 = arith.maximumf %109, %110 : vector<16x32xf32>
    %c0_41 = arith.constant 0 : index
    %c0_42 = arith.constant 0 : index
    %112 = vector.load %arg14[%c0_41, %c0_42] : memref<32x32xf32, #tpu.memory_space<vmem>>, vector<32x32xf32>
    %cst_43 = arith.constant dense<0.000000e+00> : vector<16x32xf32>
    %113 = tpu.matmul %111, %112, %cst_43 {dimension_numbers = #tpu.dot_dimension_numbers<[1], [0], [0], [1], [0, 0, 1, 1], [], []>} : vector<16x32xf32>, vector<32x32xf32>, vector<16x32xf32> -> vector<16x32xf32>
    %c0_44 = arith.constant 0 : index
    %c0_45 = arith.constant 0 : index
    %114 = vector.load %arg15[%c0_44, %c0_45] : memref<1x32xf32, #tpu.memory_space<vmem>>, vector<1x32xf32>
    %115 = vector.broadcast %114 : vector<1x32xf32> to vector<16x32xf32>
    %116 = arith.addf %113, %115 : vector<16x32xf32>
    %cst_46 = arith.constant 0.000000e+00 : f32
    %117 = vector.broadcast %cst_46 : f32 to vector<16x32xf32>
    %118 = arith.maximumf %116, %117 : vector<16x32xf32>
    %c0_47 = arith.constant 0 : index
    %c0_48 = arith.constant 0 : index
    %119 = vector.load %arg16[%c0_47, %c0_48] : memref<32x32xf32, #tpu.memory_space<vmem>>, vector<32x32xf32>
    %cst_49 = arith.constant dense<0.000000e+00> : vector<16x32xf32>
    %120 = tpu.matmul %118, %119, %cst_49 {dimension_numbers = #tpu.dot_dimension_numbers<[1], [0], [0], [1], [0, 0, 1, 1], [], []>} : vector<16x32xf32>, vector<32x32xf32>, vector<16x32xf32> -> vector<16x32xf32>
    %c0_50 = arith.constant 0 : index
    %c0_51 = arith.constant 0 : index
    %121 = vector.load %arg17[%c0_50, %c0_51] : memref<1x32xf32, #tpu.memory_space<vmem>>, vector<1x32xf32>
    %122 = vector.broadcast %121 : vector<1x32xf32> to vector<16x32xf32>
    %123 = arith.addf %120, %122 : vector<16x32xf32>
    %c0_52 = arith.constant 0 : index
    %c0_53 = arith.constant 0 : index
    %124 = vector.load %arg33[%c0_52, %c0_53] : memref<16x32xf32, #tpu.memory_space<vmem>>, vector<16x32xf32>
    tpu.vector_store %arg33[%c0_52, %c0_53], %123 {strides = array<i32>} : memref<16x32xf32, #tpu.memory_space<vmem>>, vector<16x32xf32>,
    %c0_54 = arith.constant 0 : index
    %c0_55 = arith.constant 0 : index
    %125 = vector.load %arg30[%c0_54, %c0_55] : memref<12x4xf32, #tpu.memory_space<vmem>>, vector<12x4xf32>
    %c0_56 = arith.constant 0 : index
    %c0_57 = arith.constant 0 : index
    %126 = vector.load %arg18[%c0_56, %c0_57] : memref<32x32xf32, #tpu.memory_space<vmem>>, vector<32x32xf32>
    %cst_58 = arith.constant dense<0.000000e+00> : vector<32x32xf32>
    %127 = tpu.matmul %54, %126, %cst_58 {dimension_numbers = #tpu.dot_dimension_numbers<[1], [0], [0], [1], [0, 0, 1, 1], [], []>} : vector<32x32xf32>, vector<32x32xf32>, vector<32x32xf32> -> vector<32x32xf32>
    %c0_59 = arith.constant 0 : index
    %c0_60 = arith.constant 0 : index
    %128 = vector.load %arg19[%c0_59, %c0_60] : memref<1x32xf32, #tpu.memory_space<vmem>>, vector<1x32xf32>
    %129 = vector.broadcast %128 : vector<1x32xf32> to vector<32x32xf32>
    %130 = arith.addf %127, %129 : vector<32x32xf32>
    %cst_61 = arith.constant 0.000000e+00 : f32
    %131 = vector.broadcast %cst_61 : f32 to vector<32x32xf32>
    %132 = arith.maximumf %130, %131 : vector<32x32xf32>
    %c0_62 = arith.constant 0 : index
    %c0_63 = arith.constant 0 : index
    %133 = vector.load %arg20[%c0_62, %c0_63] : memref<32x32xf32, #tpu.memory_space<vmem>>, vector<32x32xf32>
    %cst_64 = arith.constant dense<0.000000e+00> : vector<32x32xf32>
    %134 = tpu.matmul %132, %133, %cst_64 {dimension_numbers = #tpu.dot_dimension_numbers<[1], [0], [0], [1], [0, 0, 1, 1], [], []>} : vector<32x32xf32>, vector<32x32xf32>, vector<32x32xf32> -> vector<32x32xf32>
    %c0_65 = arith.constant 0 : index
    %c0_66 = arith.constant 0 : index
    %135 = vector.load %arg21[%c0_65, %c0_66] : memref<1x32xf32, #tpu.memory_space<vmem>>, vector<1x32xf32>
    %136 = vector.broadcast %135 : vector<1x32xf32> to vector<32x32xf32>
    %137 = arith.addf %134, %136 : vector<32x32xf32>
    %cst_67 = arith.constant 0.000000e+00 : f32
    %138 = vector.broadcast %cst_67 : f32 to vector<32x32xf32>
    %139 = arith.maximumf %137, %138 : vector<32x32xf32>
    %c0_68 = arith.constant 0 : index
    %c0_69 = arith.constant 0 : index
    %140 = vector.load %arg22[%c0_68, %c0_69] : memref<32x4xf32, #tpu.memory_space<vmem>>, vector<32x4xf32>
    %cst_70 = arith.constant dense<0.000000e+00> : vector<32x4xf32>
    %141 = tpu.matmul %139, %140, %cst_70 {dimension_numbers = #tpu.dot_dimension_numbers<[1], [0], [0], [1], [0, 0, 1, 1], [], []>} : vector<32x32xf32>, vector<32x4xf32>, vector<32x4xf32> -> vector<32x4xf32>
    %c0_71 = arith.constant 0 : index
    %c0_72 = arith.constant 0 : index
    %142 = vector.load %arg23[%c0_71, %c0_72] : memref<1x4xf32, #tpu.memory_space<vmem>>, vector<1x4xf32>
    %143 = vector.broadcast %142 : vector<1x4xf32> to vector<32x4xf32>
    %144 = arith.addf %141, %143 : vector<32x4xf32>
    %145 = vector.extract_strided_slice %31 {offsets = [0, 0], sizes = [32, 4], strides = [1, 1]} : vector<32x12xf32> to vector<32x4xf32>
    %146 = vector.extract_strided_slice %32 {offsets = [0, 0], sizes = [32, 4], strides = [1, 1]} : vector<32x12xf32> to vector<32x4xf32>
    %147 = vector.extract_strided_slice %33 {offsets = [0, 0], sizes = [32, 4], strides = [1, 1]} : vector<32x12xf32> to vector<32x4xf32>
    %148 = tpu.concatenate %145, %146, %147 in 1 : vector<32x4xf32>, vector<32x4xf32>, vector<32x4xf32> -> vector<32x12xf32>
    %cst_73 = arith.constant dense<0.000000e+00> : vector<32x4xf32>
    %149 = tpu.matmul %148, %125, %cst_73 {dimension_numbers = #tpu.dot_dimension_numbers<[1], [0], [0], [1], [0, 0, 1, 1], [], []>} : vector<32x12xf32>, vector<12x4xf32>, vector<32x4xf32> -> vector<32x4xf32>
    %150 = arith.mulf %144, %149 : vector<32x4xf32>
    %151 = vector.extract_strided_slice %31 {offsets = [0, 4], sizes = [32, 4], strides = [1, 1]} : vector<32x12xf32> to vector<32x4xf32>
    %152 = vector.extract_strided_slice %32 {offsets = [0, 4], sizes = [32, 4], strides = [1, 1]} : vector<32x12xf32> to vector<32x4xf32>
    %153 = vector.extract_strided_slice %33 {offsets = [0, 4], sizes = [32, 4], strides = [1, 1]} : vector<32x12xf32> to vector<32x4xf32>
    %154 = tpu.concatenate %151, %152, %153 in 1 : vector<32x4xf32>, vector<32x4xf32>, vector<32x4xf32> -> vector<32x12xf32>
    %cst_74 = arith.constant dense<0.000000e+00> : vector<32x4xf32>
    %155 = tpu.matmul %154, %125, %cst_74 {dimension_numbers = #tpu.dot_dimension_numbers<[1], [0], [0], [1], [0, 0, 1, 1], [], []>} : vector<32x12xf32>, vector<12x4xf32>, vector<32x4xf32> -> vector<32x4xf32>
    %156 = arith.mulf %144, %155 : vector<32x4xf32>
    %157 = vector.extract_strided_slice %31 {offsets = [0, 8], sizes = [32, 4], strides = [1, 1]} : vector<32x12xf32> to vector<32x4xf32>
    %158 = vector.extract_strided_slice %32 {offsets = [0, 8], sizes = [32, 4], strides = [1, 1]} : vector<32x12xf32> to vector<32x4xf32>
    %159 = vector.extract_strided_slice %33 {offsets = [0, 8], sizes = [32, 4], strides = [1, 1]} : vector<32x12xf32> to vector<32x4xf32>
    %160 = tpu.concatenate %157, %158, %159 in 1 : vector<32x4xf32>, vector<32x4xf32>, vector<32x4xf32> -> vector<32x12xf32>
    %cst_75 = arith.constant dense<0.000000e+00> : vector<32x4xf32>
    %161 = tpu.matmul %160, %125, %cst_75 {dimension_numbers = #tpu.dot_dimension_numbers<[1], [0], [0], [1], [0, 0, 1, 1], [], []>} : vector<32x12xf32>, vector<12x4xf32>, vector<32x4xf32> -> vector<32x4xf32>
    %162 = arith.mulf %144, %161 : vector<32x4xf32>
    %163 = tpu.concatenate %150, %156, %162 in 1 : vector<32x4xf32>, vector<32x4xf32>, vector<32x4xf32> -> vector<32x12xf32>
    %cst_76 = arith.constant dense<0.000000e+00> : vector<16x12xf32>
    %164 = tpu.matmul %26, %163, %cst_76 {dimension_numbers = #tpu.dot_dimension_numbers<[1], [0], [0], [1], [0, 0, 1, 1], [], []>} : vector<16x32xf32>, vector<32x12xf32>, vector<16x12xf32> -> vector<16x12xf32>
    %c0_77 = arith.constant 0 : index
    %c0_78 = arith.constant 0 : index
    %165 = vector.load %arg31[%c0_77, %c0_78] : memref<8x4xf32, #tpu.memory_space<vmem>>, vector<8x4xf32>
    %c0_79 = arith.constant 0 : index
    %c0_80 = arith.constant 0 : index
    %166 = vector.load %arg24[%c0_79, %c0_80] : memref<80x32xf32, #tpu.memory_space<vmem>>, vector<80x32xf32>
    %cst_81 = arith.constant dense<0.000000e+00> : vector<16x32xf32>
    %167 = tpu.matmul %104, %166, %cst_81 {dimension_numbers = #tpu.dot_dimension_numbers<[1], [0], [0], [1], [0, 0, 1, 1], [], []>} : vector<16x80xf32>, vector<80x32xf32>, vector<16x32xf32> -> vector<16x32xf32>
    %c0_82 = arith.constant 0 : index
    %c0_83 = arith.constant 0 : index
    %168 = vector.load %arg25[%c0_82, %c0_83] : memref<1x32xf32, #tpu.memory_space<vmem>>, vector<1x32xf32>
    %169 = vector.broadcast %168 : vector<1x32xf32> to vector<16x32xf32>
    %170 = arith.addf %167, %169 : vector<16x32xf32>
    %cst_84 = arith.constant 0.000000e+00 : f32
    %171 = vector.broadcast %cst_84 : f32 to vector<16x32xf32>
    %172 = arith.maximumf %170, %171 : vector<16x32xf32>
    %c0_85 = arith.constant 0 : index
    %c0_86 = arith.constant 0 : index
    %173 = vector.load %arg26[%c0_85, %c0_86] : memref<32x32xf32, #tpu.memory_space<vmem>>, vector<32x32xf32>
    %cst_87 = arith.constant dense<0.000000e+00> : vector<16x32xf32>
    %174 = tpu.matmul %172, %173, %cst_87 {dimension_numbers = #tpu.dot_dimension_numbers<[1], [0], [0], [1], [0, 0, 1, 1], [], []>} : vector<16x32xf32>, vector<32x32xf32>, vector<16x32xf32> -> vector<16x32xf32>
    %c0_88 = arith.constant 0 : index
    %c0_89 = arith.constant 0 : index
    %175 = vector.load %arg27[%c0_88, %c0_89] : memref<1x32xf32, #tpu.memory_space<vmem>>, vector<1x32xf32>
    %176 = vector.broadcast %175 : vector<1x32xf32> to vector<16x32xf32>
    %177 = arith.addf %174, %176 : vector<16x32xf32>
    %cst_90 = arith.constant 0.000000e+00 : f32
    %178 = vector.broadcast %cst_90 : f32 to vector<16x32xf32>
    %179 = arith.maximumf %177, %178 : vector<16x32xf32>
    %c0_91 = arith.constant 0 : index
    %c0_92 = arith.constant 0 : index
    %180 = vector.load %arg28[%c0_91, %c0_92] : memref<32x4xf32, #tpu.memory_space<vmem>>, vector<32x4xf32>
    %cst_93 = arith.constant dense<0.000000e+00> : vector<16x4xf32>
    %181 = tpu.matmul %179, %180, %cst_93 {dimension_numbers = #tpu.dot_dimension_numbers<[1], [0], [0], [1], [0, 0, 1, 1], [], []>} : vector<16x32xf32>, vector<32x4xf32>, vector<16x4xf32> -> vector<16x4xf32>
    %c0_94 = arith.constant 0 : index
    %c0_95 = arith.constant 0 : index
    %182 = vector.load %arg29[%c0_94, %c0_95] : memref<1x4xf32, #tpu.memory_space<vmem>>, vector<1x4xf32>
    %183 = vector.broadcast %182 : vector<1x4xf32> to vector<16x4xf32>
    %184 = arith.addf %181, %183 : vector<16x4xf32>
    %185 = vector.extract_strided_slice %164 {offsets = [0, 0], sizes = [16, 4], strides = [1, 1]} : vector<16x12xf32> to vector<16x4xf32>
    %186 = tpu.concatenate %56, %185 in 1 : vector<16x4xf32>, vector<16x4xf32> -> vector<16x8xf32>
    %cst_96 = arith.constant dense<0.000000e+00> : vector<16x4xf32>
    %187 = tpu.matmul %186, %165, %cst_96 {dimension_numbers = #tpu.dot_dimension_numbers<[1], [0], [0], [1], [0, 0, 1, 1], [], []>} : vector<16x8xf32>, vector<8x4xf32>, vector<16x4xf32> -> vector<16x4xf32>
    %188 = arith.mulf %184, %187 : vector<16x4xf32>
    %189 = vector.extract_strided_slice %164 {offsets = [0, 4], sizes = [16, 4], strides = [1, 1]} : vector<16x12xf32> to vector<16x4xf32>
    %190 = tpu.concatenate %57, %189 in 1 : vector<16x4xf32>, vector<16x4xf32> -> vector<16x8xf32>
    %cst_97 = arith.constant dense<0.000000e+00> : vector<16x4xf32>
    %191 = tpu.matmul %190, %165, %cst_97 {dimension_numbers = #tpu.dot_dimension_numbers<[1], [0], [0], [1], [0, 0, 1, 1], [], []>} : vector<16x8xf32>, vector<8x4xf32>, vector<16x4xf32> -> vector<16x4xf32>
    %192 = arith.mulf %184, %191 : vector<16x4xf32>
    %193 = vector.extract_strided_slice %164 {offsets = [0, 8], sizes = [16, 4], strides = [1, 1]} : vector<16x12xf32> to vector<16x4xf32>
    %194 = tpu.concatenate %58, %193 in 1 : vector<16x4xf32>, vector<16x4xf32> -> vector<16x8xf32>
    %cst_98 = arith.constant dense<0.000000e+00> : vector<16x4xf32>
    %195 = tpu.matmul %194, %165, %cst_98 {dimension_numbers = #tpu.dot_dimension_numbers<[1], [0], [0], [1], [0, 0, 1, 1], [], []>} : vector<16x8xf32>, vector<8x4xf32>, vector<16x4xf32> -> vector<16x4xf32>
    %196 = arith.mulf %184, %195 : vector<16x4xf32>
    %197 = tpu.concatenate %188, %192, %196 in 1 : vector<16x4xf32>, vector<16x4xf32>, vector<16x4xf32> -> vector<16x12xf32>
    %c0_99 = arith.constant 0 : index
    %c0_100 = arith.constant 0 : index
    %198 = vector.load %arg32[%c0_99, %c0_100] : memref<16x12xf32, #tpu.memory_space<vmem>>, vector<16x12xf32>
    tpu.vector_store %arg32[%c0_99, %c0_100], %197 {strides = array<i32>} : memref<16x12xf32, #tpu.memory_space<vmem>>, vector<16x12xf32>,
    return
  }
}

</mosaic_0001>

<bundles_post_ra>
// kernel: tpu_custom_call.1
= control target key start
LH: loop header
LB: loop body
LE: loop exit
PB: predicated region body
PF: predicated region fallthrough
CT: control target
= control target key end

     0   :  { %s2074_s6 = smov 1   ;;  %s2075_s10 = smov 2   ;;  %s2847_s0 = inlined_call_operand.smem [shape: u32[34], index: -1, kind: input, shape index: {}] }
   0x1   :  { %s2138_s5 = sld [smem:[%s2847_s0]]   ;;  %s2076_s14 = smov 3  }
   0x2   :  { %s2143_s9 = sld [smem:[%s2847_s0 + %s2074_s6]]   ;;  %s2077_s18 = smov 4  }
   0x3   :  { %s2148_s13 = sld [smem:[%s2847_s0 + %s2075_s10]]   ;;  %s2078_s22 = smov 5  }
   0x4   :  { %s2153_s17 = sld [smem:[%s2847_s0 + %s2076_s14]]   ;;  %s2079_s26 = smov 6  }
   0x5   :  { %s2158_s21 = sld [smem:[%s2847_s0 + %s2077_s18]]   ;;  %s2080_s30 = smov 7  }
   0x6   :  { %s2163_s25 = sld [smem:[%s2847_s0 + %s2078_s22]]   ;;  %s2081_s4 = smov 8  }
   0x7   :  { %s2168_s29 = sld [smem:[%s2847_s0 + %s2079_s26]]   ;;  %s2082_s10 = smov 9  }
   0x8   :  { %s2173_s3 = sld [smem:[%s2847_s0 + %s2080_s30]]   ;;  %s2083_s15 = smov 10  }
   0x9   :  { %s2178_s8 = sld [smem:[%s2847_s0 + %s2081_s4]]   ;;  %s2084_s20 = smov 11  }
   0xa   :  { %s2183_s14 = sld [smem:[%s2847_s0 + %s2082_s10]]   ;;  %s2085_s26 = smov 12  }
   0xb   :  { %s2188_s19 = sld [smem:[%s2847_s0 + %s2083_s15]]   ;;  %s2086_s1 = smov 13  }
   0xc   :  { %s2193_s24 = sld [smem:[%s2847_s0 + %s2084_s20]]   ;;  %s2087_s7 = smov 14  }
   0xd   :  { %s2198_s30 = sld [smem:[%s2847_s0 + %s2085_s26]]   ;;  %s2088_s15 = smov 15  }
   0xe   :  { %s2203_s6 = sld [smem:[%s2847_s0 + %s2086_s1]]   ;;  %s2089_s22 = smov 16  }
   0xf   :  { %s2208_s12 = sld [smem:[%s2847_s0 + %s2087_s7]]   ;;  %s2090_s28 = smov 17  }
  0x10   :  { %s2213_s20 = sld [smem:[%s2847_s0 + %s2088_s15]]   ;;  %s2091_s7 = smov 18  }
  0x11   :  { %s2218_s27 = sld [smem:[%s2847_s0 + %s2089_s22]]   ;;  %s2092_s15 = smov 19  }
  0x12   :  { %s2223_s4 = sld [smem:[%s2847_s0 + %s2090_s28]]   ;;  %s2093_s22 = smov 20  }
  0x13   :  { %s2094_s28 = smov 21  }
  0x14   :  { %2855 = sst [smem:[#allocation8_spill]] %s2203_s6 }
  0x15   :  { %2856 = sst [smem:[#allocation9_spill]] %s2208_s12 }
  0x16   :  { %2857 = sst [smem:[#allocation10_spill]] %s2213_s20 }
  0x17   :  { %2858 = sst [smem:[#allocation11_spill]] %s2218_s27 }
  0x18   :  { %2859 = sst [smem:[#allocation12_spill]] %s2223_s4 }
  0x19   :  { %s2228_s6 = sld [smem:[%s2847_s0 + %s2091_s7]]   ;;  %s2095_s7 = smov 22  }
  0x1a   :  { %s2233_s20 = sld [smem:[%s2847_s0 + %s2092_s15]]   ;;  %s2096_s15 = smov 23  }
  0x1b   :  { %s2238_s27 = sld [smem:[%s2847_s0 + %s2093_s22]]   ;;  %s2097_s22 = smov 24  }
  0x1c   :  { %s2243_s4 = sld [smem:[%s2847_s0 + %s2094_s28]]   ;;  %s2098_s28 = smov 25  }
  0x1d   :  { %s2248_s12 = sld [smem:[%s2847_s0 + %s2095_s7]]   ;;  %s2099_s7 = smov 26  }
  0x20   :  { %2860 = sst [smem:[#allocation13_spill]] %s2233_s20 }
  0x21   :  { %2861 = sst [smem:[#allocation14_spill]] %s2238_s27 }
  0x22   :  { %2862 = sst [smem:[#allocation15_spill]] %s2243_s4 }
  0x23   :  { %2863 = sst [smem:[#allocation16_spill]] %s2248_s12 }
  0x24   :  { %s2253_s20 = sld [smem:[%s2847_s0 + %s2096_s15]]   ;;  %s2100_s15 = smov 27  }
  0x25   :  { %s2258_s27 = sld [smem:[%s2847_s0 + %s2097_s22]]   ;;  %s2101_s22 = smov 28  }
  0x26   :  { %s2263_s4 = sld [smem:[%s2847_s0 + %s2098_s28]]   ;;  %s2102_s28 = smov 29  }
  0x27   :  { %s2268_s12 = sld [smem:[%s2847_s0 + %s2099_s7]]   ;;  %s2103_s7 = smov 30  }
  0x2a   :  { %2864 = sst [smem:[#allocation17_spill]] %s2253_s20 }
  0x2b   :  { %2865 = sst [smem:[#allocation18_spill]] %s2258_s27 }
  0x2c   :  { %2866 = sst [smem:[#allocation19_spill]] %s2263_s4 }
  0x2d   :  { %2867 = sst [smem:[#allocation20_spill]] %s2268_s12 }
  0x2e   :  { %s2273_s20 = sld [smem:[%s2847_s0 + %s2100_s15]]   ;;  %s2104_s15 = smov 31  }
  0x2f   :  { %s2278_s27 = sld [smem:[%s2847_s0 + %s2101_s22]]   ;;  %s2105_s22 = smov 32  }
  0x30   :  { %s2283_s4 = sld [smem:[%s2847_s0 + %s2102_s28]]   ;;  %s2106_s28 = smov 33  }
  0x31   :  { %s2288_s12 = sld [smem:[%s2847_s0 + %s2103_s7]]  }
  0x34   :  { %2868 = sst [smem:[#allocation21_spill]] %s2273_s20 }
  0x35   :  { %2869 = sst [smem:[#allocation22_spill]] %s2278_s27 }
  0x36   :  { %2870 = sst [smem:[#allocation23_spill]] %s2283_s4 }
  0x37   :  { %s2293_s20 = sld [smem:[%s2847_s0 + %s2104_s15]]  }
  0x38   :  { %s2298_s27 = sld [smem:[%s2847_s0 + %s2105_s22]]  }
  0x39   :  { %s2303_s4 = sld [smem:[%s2847_s0 + %s2106_s28]]  }
  0x3a   :  { %73 = vsyncpa [#allocation3], 0  ;;  %v143_v0 = vld [vmem:[%s2143_s9 + $0x18] sm:$0xff]  ;;  %v141_v1 = vld [vmem:[%s2143_s9 + $0x8] sm:$0xff]  ;;  %v2107_v2 = vmov 1   ;;  %v2108_v3 = vmov 0  }
  0x3b   :  { %1954 = vset.pattern.permute.xlu1 %v2107_v2  ;;  %1952 = vset.pattern.permute.xlu0 %v2108_v3  ;;  %v246_v4 = vld [vmem:[%s2153_s17 + $0x8] sm:$0xff] }
  0x3c   :  { %166 = vperm.xlu0 %1952, %v143_v0   ;;  %184 = vperm.xlu1 %1954, %v141_v1  }
  0x3d   :  { %1955 = vset.pattern.permute.xlu2 %v2107_v2  ;;  %1894 = vmatpush.msra.mxu1 %v246_v4 }
  0x3e   :  { %190 = vperm.xlu2 %1955, %v143_v0   ;;  %274 = vmatpush.msra.mxu0 %v246_v4 }
  0x3f   :  { %74 = vsyncpa [#allocation5], 0  ;;  %v142_v5 = vld [vmem:[%s2143_s9 + $0x10] sm:$0xff]  ;;  %v140_v6 = vld [vmem:[%s2143_s9] sm:$0xff]  ;;  %v144_v11 = vlaneseq  ;;  %vm247_vm1 = vcmask 130048   ;;  %v2109_v14 = vmov 0.0  }
  0x40   :  { %v2317_v7 = vld [vmem:[%s2153_s17] sm:$0xff]  ;;  %v2322_v8 = vld [vmem:[%s2148_s13 + $0x8] sm:$0xff]  ;;  %s2110_s0 = smov 64   ;;  %v2111_v32 = vmov 5   ;;  %s2112_s9 = smov 32   ;;  %v2113_v33 = vmov 6  }
  0x41   :  { %1895 = vmatpush.msra.mxu1 %v2317_v7  ;;  %275 = vmatpush.msra.mxu0 %v2317_v7  ;;  %v2328_v10 = vld [vmem:[%s2148_s13] sm:$0xff]  ;;  %v148_v12 = vand.u32 127, %v144_v11  ;;  %v395_v34 = vld [vmem:[%s2163_s25 + $0x8] sm:$0xff]  ;;  %v396_v36 = vld [vmem:[%s2163_s25 + $0x10] sm:$0xff]  ;;  %v2114_v40 = vmov 11   ;;  %v145_v42 = vshrl.u32 %v144_v11, 7 }
  0x42   :  { %346 = vmatpush.msra.mxu2 %v2322_v8  ;;  %375 = vmatpush.msra.mxu3 %v2322_v8  ;;  %v394_v29 = vld [vmem:[%s2163_s25] sm:$0xff]  ;;  %v397_v38 = vld [vmem:[%s2163_s25 + $0x18] sm:$0xff]  ;;  %v2115_v44 = vmov 9   ;;  %vm204_vm10 = vcmask 261120   ;;  %v2116_v47 = vmov 7   ;;  %v2117_v50 = vmov 10  }
  0x43   :  { %315 = vmatpush.msrb.mxu1 %v246_v4  ;;  %v139_v41 = vld [vmem:[%s2138_s5] sm:$0x3]  ;;  %v446_v49 = vld [vmem:[%s2168_s29 + $0x38] sm:$0xff]  ;;  %v445_v51 = vld [vmem:[%s2168_s29 + $0x30] sm:$0xff]  ;;  %v146_v59 = vadd.s32 8, %v145_v42  ;;  %vm434_vm12 = vcmask 523264  }
  0x44   :  { %1953 = vset.pattern.permute.xlu0 %v2107_v2  ;;  %187 = vperm.xlu1 %1954, %v142_v5   ;;  %v149_v43 = vperm.slane %v139_v41, 0  ;;  %v447_v48 = vld [vmem:[%s2168_s29 + $0x40] sm:$0xff]  ;;  %v444_v52 = vld [vmem:[%s2168_s29 + $0x28] sm:$0xff]  ;;  %v442_v54 = vld [vmem:[%s2168_s29 + $0x18] sm:$0xff]  ;;  %vm452_vm13 = vcmask 588800   ;;  %s2122_s5 = smov 124  }
  0x45   :  { %181 = vperm.xlu0 %1953, %v140_v6   ;;  %316 = vmatpush.msrb.mxu1 %v2317_v7  ;;  %v443_v53 = vld [vmem:[%s2168_s29 + $0x20] sm:$0xff]  ;;  %v441_v55 = vld [vmem:[%s2168_s29 + $0x10] sm:$0xff]  ;;  %v440_v56 = vld [vmem:[%s2168_s29 + $0x8] sm:$0xff]  ;;  %s2123_s25 = smov 120   ;;  %vm855_vm14 = vcmask 31744   ;;  %vm858_vm15 = vcmask 64512  }
  0x46   :  { %1956 = vset.pattern.permute.xlu2 %v2108_v3  ;;  %347 = vmatpush.msra.mxu2 %v2328_v10  ;;  %vm150_vm9 = vcmp.eq.s32.totalorder %v145_v42, %v149_v43  ;;  %v439_v57 = vld [vmem:[%s2168_s29] sm:$0xff]  ;;  %vm151_vm11 = vcmp.eq.s32.totalorder %v146_v59, %v149_v43  ;;  %v500_v41 = vld [vmem:[%s2178_s8 + $0x10] sm:$0xff]  ;;  %v499_v42 = vld [vmem:[%s2178_s8 + $0x8] sm:$0xff]  ;;  %s2124_s29 = smov 4   ;;  %s2879_s7 = sld [smem:[#allocation18_spill]] }
  0x47   :  { %157 = vperm.xlu2 %1956, %v140_v6   ;;  %376 = vmatpush.msra.mxu3 %v2328_v10  ;;  %v2378_v45 = vsel %vm150_vm9, 1.0, %v2109_v14  ;;  %v2401_v60 = vsel %vm151_vm11, 1.0, %v2109_v14  ;;  %v498_v43 = vld [vmem:[%s2178_s8] sm:$0xff]  ;;  %vm898_vm9 = vcmask 654336   ;;  %vm1217_vm11 = vcmask 1043456   ;;  %s2880_s10 = sld [smem:[#allocation17_spill]] }
  0x48   :  { %v205_v46 = vsel %vm204_vm10, %v2378_v45, 0.0  ;;  %472 = vmatpush.msrb.mxu0 %v447_v48  ;;  %v208_v62 = vsel %vm204_vm10, %v2401_v60, 0.0  ;;  %s2881_s11 = sld [smem:[#allocation12_spill]]  ;;  %s2127_s22 = smov [#allocation4]  }
  0x49   :  { %s2883_s15 = sld [smem:[#allocation19_spill]]  ;;  %s1755_s23 = sshll.u32 %s2127_s22, 4  ;;  %s1756_s23 = int_to_ptr.vmem [resolvable:$true] %s1755_s23 }
  0x4a   :  { %473 = vmatpush.msrb.mxu0 %v446_v49  ;;  %s2884_s16 = sld [smem:[#allocation22_spill]]  ;;  %s1757_s26 = sshll.u32 %s2303_s4, 4  ;;  %s1758_s26 = int_to_ptr.hbm [resolvable:$true] %s1757_s26 }
  0x4b   :  { %s2885_s18 = sld [smem:[#allocation21_spill]]  ;;  %s2034_s28 = sshra.s32 %s1758_s26, 4  ;;  %s2035_s28 = int_to_ptr.hbm [resolvable:$true] %s2034_s28 }
  0x4c   :  { %1957 = vset.pattern.permute.xlu1 %v2108_v3  ;;  %474 = vmatpush.msrb.mxu0 %v445_v51  ;;  %s2036_s1 = scalar_lea.hbm %s2035_s28, 16  ;;  %s2038_s2 = scalar_lea.hbm %s2303_s4, 16 }
  0x4d   :  { %160 = vperm.xlu1 %1957, %v141_v1   ;;  %1965 = vset.pattern.permute.xlu0 %v2113_v33  ;;  %p2037_p0 = scmp.ne.s32.totalorder %s2035_s28, %s2036_s1  ;;  %p2039_p1 = scmp.lt.s32.totalorder %s2035_s28, %s2303_s4 }
  0x4e   :  { %475 = vmatpush.msrb.mxu0 %v444_v52  ;;  %v2003_v52 = vld [vmem:[%s2173_s3] ss:$0 sm:$0xff]  ;;  %s2125_s3 = smov 8   ;;  %p2040_p2 = scmp.lt.s32.totalorder %s2038_s2, %s2036_s1 }
  0x4f   :  { %163 = vperm.xlu2 %1956, %v142_v5  }
  0x50   :  { %476 = vmatpush.msrb.mxu0 %v443_v53  ;;  %p2041_p3 = por %p2040_p2, %p2039_p1 }
  0x52   :  { %477 = vmatpush.msrb.mxu0 %v442_v54  ;;  %p2042_p4 = pnand %p2041_p3, %p2037_p0 }
  0x54   :  { %478 = vmatpush.msrb.mxu0 %v441_v55 }
  0x55   :  { %418 = vrot.lane.b32.xlu1 %v394_v29, %s2110_s0  ;;  %v501_v29 = vld [vmem:[%s2178_s8 + $0x18] sm:$0xff]  ;;  %s2126_s8 = smov 12  }
  0x56   :  { %1958 = vset.pattern.permute.xlu1 %v2111_v32  ;;  %479 = vmatpush.msrb.mxu0 %v440_v56 }
  0x57   :  { %1963 = vset.pattern.permute.xlu2 %v2114_v40 }
  0x58   :  { %480 = vmatpush.msrb.mxu0 %v439_v57 }
  0x98   :  { %v191_v9 = vpop.permute.xlu2 %190 }
  0x99   :  { %vm195_vm8 = vcmp.eq.s32.totalorder %v148_v12, %v191_v9 }
  0x9a   :  { %v1816_v28 = vsel %vm195_vm8, 1.0, %v2109_v14 }
  0xa1   :  { %v158_v13 = vpop.permute.xlu2 %157 }
  0xa2   :  { %vm168_vm0 = vcmp.eq.s32.totalorder %v148_v12, %v158_v13 }
  0xa3   :  { %v1809_v15 = vsel %vm168_vm0, 1.0, %v2109_v14  ;;  %vm861_vm0 = vcmask 97280  }
  0xa4   :  { %1825 = vmatmul.msk.f32.vlgmr.msra.gmra.mxu2 %vm247_vm1, %v1809_v15  ;;  %1817 = vmatmul.msk.f32.vlgmr.msra.gmra.mxu0 %vm247_vm1, %v1809_v15 }
  0xa9   :  { %v164_v25 = vpop.permute.xlu2 %163 }
  0xaa   :  { %vm170_vm6 = vcmp.eq.s32.totalorder %v148_v12, %v164_v25  ;;  %v2121_v25 = vmov 2  }
  0xab   :  { %v1811_v26 = vsel %vm170_vm6, 1.0, %v2109_v14 }
  0xae   :  { %v167_v16 = vpop.permute.xlu0 %166  ;;  %v185_v17 = vpop.permute.xlu1 %184 }
  0xaf   :  { %vm171_vm2 = vcmp.eq.s32.totalorder %v148_v12, %v167_v16  ;;  %vm193_vm4 = vcmp.eq.s32.totalorder %v148_v12, %v185_v17 }
  0xb0   :  { %v1812_v18 = vsel %vm171_vm2, 1.0, %v2109_v14  ;;  %v1814_v22 = vsel %vm193_vm4, 1.0, %v2109_v14 }
  0xb1   :  { %1820 = vmatmul.msk.f32.vlgmr.msra.gmra.mxu1 %vm247_vm1, %v1812_v18 }
  0xb2   :  { %530 = vmatpush.msra.mxu1 %v501_v29 }
  0xb4   :  { %531 = vmatpush.msra.mxu1 %v500_v41 }
  0xb6   :  { %v188_v19 = vpop.permute.xlu1 %187  ;;  %532 = vmatpush.msra.mxu1 %v499_v42 }
  0xb7   :  { %v182_v20 = vpop.permute.xlu0 %181  ;;  %vm194_vm7 = vcmp.eq.s32.totalorder %v148_v12, %v188_v19 }
  0xb8   :  { %vm192_vm3 = vcmp.eq.s32.totalorder %v148_v12, %v182_v20  ;;  %v1815_v27 = vsel %vm194_vm7, 1.0, %v2109_v14  ;;  %533 = vmatpush.msra.mxu1 %v498_v43 }
  0xb9   :  { %v1813_v21 = vsel %vm192_vm3, 1.0, %v2109_v14 }
  0xba   :  { %1821 = vmatmul.msk.f32.vlgmr.msrb.gmra.mxu1 %vm247_vm1, %v1813_v21  ;;  %1829 = vmatmul.msk.f32.vlgmr.msra.gmra.mxu3 %vm247_vm1, %v1813_v21 }
  0xbf   :  { %v161_v23 = vpop.permute.xlu1 %160 }
  0xc0   :  { %vm169_vm5 = vcmp.eq.s32.totalorder %v148_v12, %v161_v23  ;;  %v2118_v12 = vmov 8   ;;  %v2120_v23 = vmov 3  }
  0xc1   :  { %v1810_v24 = vsel %vm169_vm5, 1.0, %v2109_v14 }
  0xc2   :  { %1822 = vmatmul.msk.f32.gmra.mxu1 %vm247_vm1, %v1814_v22  ;;  %1826 = vmatmul.msk.f32.gmra.mxu2 %vm247_vm1, %v1810_v24 }
  0xc3   :  { %1830 = vmatmul.msk.f32.gmra.mxu3 %vm247_vm1, %v1814_v22  ;;  %1818 = vmatmul.msk.f32.gmra.mxu0 %vm247_vm1, %v1810_v24  ;;  %v2119_v22 = vmov 4  }
  0xc7   :  { %v419_v61 = vpop.permute.xlu1 %418 }
  0xca   :  { %1823 = vmatmul.msk.f32.gmra.mxu1 %vm247_vm1, %v1815_v27  ;;  %1827 = vmatmul.msk.f32.gmra.mxu2 %vm247_vm1, %v1811_v26 }
  0xcb   :  { %1831 = vmatmul.msk.f32.gmra.mxu3 %vm247_vm1, %v1815_v27  ;;  %1819 = vmatmul.msk.f32.gmra.mxu0 %vm247_vm1, %v1811_v26 }
  0xd2   :  { %1824 = vmatmul.msk.f32.gmra.mxu1 %vm247_vm1, %v1816_v28  ;;  %1828 = vmatmul.msk.f32.gmra.mxu2 %vm247_vm1, %v1812_v18 }
  0xd3   :  { %1832 = vmatmul.msk.f32.gmra.mxu3 %vm247_vm1, %v1816_v28 }
 0x121   :  { %v277_v58 = vpop.f32.mrf.mxu0 }
 0x12e   :  { %v2359_v30 = vpop.f32.mrf.mxu1 }
 0x137   :  { %v318_v31 = vpop.f32.mrf.mxu1 }
 0x138   :  { %402 = vrot.lane.b32.xlu0 %v318_v31, %s2112_s9 }
 0x13f   :  { %v321_v35 = vpop.f32.mrf.mxu1 }
 0x140   :  { %420 = vrot.lane.b32.xlu0 %v395_v34, %s2110_s0  ;;  %404 = vrot.lane.b32.xlu2 %v321_v35, %s2112_s9  ;;  %v280_v4 = vpop.f32.mrf.mxu0 }
 0x147   :  { %v324_v37 = vpop.f32.mrf.mxu1 }
 0x148   :  { %422 = vrot.lane.b32.xlu2 %v396_v36, %s2110_s0  ;;  %406 = vrot.lane.b32.xlu1 %v324_v37, %s2112_s9  ;;  %v283_v14 = vpop.f32.mrf.mxu0 }
 0x14f   :  { %v327_v39 = vpop.f32.mrf.mxu1 }
 0x150   :  { %408 = vrot.lane.b32.xlu0 %v327_v39, %s2112_s9  ;;  %424 = vrot.lane.b32.xlu1 %v397_v38, %s2110_s0 }
 0x158   :  { %692 = vperm.xlu1 %1958, %v2328_v10  }
 0x160   :  { %1959 = vset.pattern.permute.xlu1 %v2113_v33 }
 0x161   :  { %742 = vperm.xlu1 %1959, %v2328_v10  }
 0x169   :  { %1960 = vset.pattern.permute.xlu1 %v2115_v44 }
 0x16a   :  { %712 = vperm.xlu1 %1960, %v2328_v10  }
 0x171   :  { %206 = vadd.xlane.f32.xlu2 %v205_v46 }
 0x172   :  { %1961 = vset.pattern.permute.xlu1 %v2116_v47 }
 0x173   :  { %792 = vperm.xlu1 %1961, %v2328_v10  }
 0x17a   :  { %209 = vadd.xlane.f32.xlu0 %v208_v62 }
 0x17b   :  { %1962 = vset.pattern.permute.xlu1 %v2117_v50 }
 0x17c   :  { %762 = vperm.xlu1 %1962, %v2328_v10  }
 0x184   :  { %1964 = vset.pattern.permute.xlu1 %v2111_v32 }
 0x185   :  { %696 = vperm.xlu1 %1964, %v2322_v8  }
 0x189   :  { %812 = vperm.xlu2 %1963, %v2328_v10  }
 0x18d   :  { %1966 = vset.pattern.permute.xlu1 %v2115_v44 }
 0x18e   :  { %716 = vperm.xlu1 %1966, %v2322_v8   ;;  %746 = vperm.xlu0 %1965, %v2322_v8  }
 0x191   :  { %1968 = vset.pattern.permute.xlu2 %v2117_v50 }
 0x192   :  { %766 = vperm.xlu2 %1968, %v2322_v8  }
 0x196   :  { %1967 = vset.pattern.permute.xlu1 %v2116_v47  ;;  %1974 = vset.pattern.permute.xlu0 %v2120_v23 }
 0x197   :  { %796 = vperm.xlu1 %1967, %v2322_v8   ;;  %782 = vperm.xlu0 %1974, %v2328_v10  }
 0x19a   :  { %v405_v5 = vpop.permute.xlu2 %404  ;;  %1970 = vset.pattern.permute.xlu2 %v2119_v22 }
 0x19b   :  { %v431_v6 = vsel %vm204_vm10, %v280_v4, %v405_v5  ;;  %642 = vperm.xlu2 %1970, %v2328_v10  }
 0x19f   :  { %1969 = vset.pattern.permute.xlu1 %v2114_v40  ;;  %1977 = vset.pattern.permute.xlu0 %v2121_v25 }
 0x1a0   :  { %816 = vperm.xlu1 %1969, %v2322_v8  }
 0x1a2   :  { %v423_v13 = vpop.permute.xlu2 %422 }
 0x1a3   :  { %1972 = vset.pattern.permute.xlu2 %v2121_v25 }
 0x1a4   :  { %732 = vperm.xlu2 %1972, %v2328_v10  }
 0x1a8   :  { %1971 = vset.pattern.permute.xlu1 %v2107_v2 }
 0x1a9   :  { %682 = vperm.xlu1 %1971, %v2328_v10  }
 0x1aa   :  { %v403_v63 = vpop.permute.xlu0 %402 }
 0x1ab   :  { %v430_v0 = vsel %vm204_vm10, %v277_v58, %v403_v63 }
 0x1ac   :  { %v435_v1 = vsel %vm434_vm12, %v430_v0, %v419_v61  ;;  %1976 = vset.pattern.permute.xlu2 %v2107_v2 }
 0x1ad   :  { %1833 = vmatmul.msk.f32.vlgmr.msrb.gmra.mxu0 %vm452_vm13, %v435_v1 }
 0x1b1   :  { %1973 = vset.pattern.permute.xlu1 %v2118_v12 }
 0x1b2   :  { %v421_v9 = vpop.permute.xlu0 %420  ;;  %662 = vperm.xlu1 %1973, %v2328_v10  }
 0x1b3   :  { %v436_v11 = vsel %vm434_vm12, %v431_v6, %v421_v9 }
 0x1b5   :  { %1834 = vmatmul.msk.f32.gmra.mxu0 %vm452_vm13, %v436_v11 }
 0x1ba   :  { %v407_v15 = vpop.permute.xlu1 %406  ;;  %1975 = vset.pattern.permute.xlu1 %v2119_v22 }
 0x1bb   :  { %v432_v16 = vsel %vm204_vm10, %v283_v14, %v407_v15 }
 0x1bc   :  { %v437_v17 = vsel %vm434_vm12, %v432_v16, %v423_v13 }
 0x1bd   :  { %1835 = vmatmul.msk.f32.gmra.mxu0 %vm452_vm13, %v437_v17 }
 0x1c2   :  { %v409_v18 = vpop.permute.xlu0 %408  ;;  %v425_v19 = vpop.permute.xlu1 %424 }
 0x1c3   :  { %v433_v20 = vsel %vm204_vm10, %v2359_v30, %v409_v18 }
 0x1c4   :  { %v438_v21 = vsel %vm434_vm12, %v433_v20, %v425_v19  ;;  %v554_v20 = vld [vmem:[%s2188_s19 + $0x18] sm:$0xff] }
 0x1c5   :  { %1836 = vmatmul.msk.f32.gmra.mxu0 %vm452_vm13, %v438_v21  ;;  %583 = vmatpush.msrb.mxu2 %v554_v20 }
 0x1ca   :  { %v693_v24 = vpop.permute.xlu1 %692 }
 0x1cb   :  { %v699_v27 = vmul.f32 %v693_v24, %v2328_v10 }
 0x1cd   :  { %703 = vrot.lane.b32.xlu2 %v699_v27, %s2122_s5 }
 0x1d3   :  { %v743_v26 = vpop.permute.xlu1 %742 }
 0x1d4   :  { %v749_v28 = vmul.f32 %v743_v26, %v2328_v10 }
 0x1d6   :  { %753 = vrot.lane.b32.xlu1 %v749_v28, %s2122_s5 }
 0x1dc   :  { %v713_v30 = vpop.permute.xlu1 %712 }
 0x1dd   :  { %v719_v31 = vmul.f32 %v713_v30, %v2328_v10 }
 0x1df   :  { %723 = vrot.lane.b32.xlu2 %v719_v31, %s2123_s25 }
 0x1e4   :  { %v2433_v32 = vpop.xlane.xlu2 %206 }
 0x1e5   :  { %v793_v33 = vpop.permute.xlu1 %792 }
 0x1e6   :  { %v799_v34 = vmul.f32 %v793_v33, %v2328_v10 }
 0x1e8   :  { %803 = vrot.lane.b32.xlu1 %v799_v34, %s2122_s5 }
 0x1ec   :  { %v813_v35 = vpop.permute.xlu2 %812 }
 0x1ed   :  { %v819_v36 = vmul.f32 %v813_v35, %v2328_v10  ;;  %v2461_v54 = vpop.xlane.xlu0 %209  ;;  %v553_v35 = vld [vmem:[%s2188_s19 + $0x10] sm:$0xff] }
 0x1ee   :  { %v763_v2 = vpop.permute.xlu1 %762  ;;  %584 = vmatpush.msrb.mxu2 %v553_v35 }
 0x1ef   :  { %823 = vrot.lane.b32.xlu0 %v819_v36, %s2123_s25  ;;  %v769_v37 = vmul.f32 %v763_v2, %v2328_v10  ;;  %v552_v2 = vld [vmem:[%s2188_s19 + $0x8] sm:$0xff] }
 0x1f0   :  { %646 = vperm.xlu1 %1975, %v2322_v8   ;;  %585 = vmatpush.msrb.mxu2 %v552_v2  ;;  %v1010_v2 = vld [vmem:[%s2228_s6] sm:$0xff] }
 0x1f1   :  { %773 = vrot.lane.b32.xlu2 %v769_v37, %s2123_s25 }
 0x1f4   :  { %v767_v48 = vpop.permute.xlu2 %766 }
 0x1f5   :  { %v770_v9 = vmul.f32 %v767_v48, %v2322_v8 }
 0x1f7   :  { %736 = vperm.xlu0 %1977, %v2322_v8   ;;  %v697_v38 = vpop.permute.xlu1 %696 }
 0x1f8   :  { %1978 = vset.pattern.permute.xlu1 %v2118_v12  ;;  %v700_v39 = vmul.f32 %v697_v38, %v2322_v8  ;;  %v551_v38 = vld [vmem:[%s2188_s19] sm:$0xff]  ;;  %s2874_s19 = sld [smem:[#allocation8_spill]] }
 0x1f9   :  { %666 = vperm.xlu1 %1978, %v2322_v8   ;;  %686 = vperm.xlu2 %1976, %v2322_v8  }
 0x1fa   :  { %586 = vmatpush.msrb.mxu2 %v551_v38  ;;  %v2005_v38 = vld [vmem:[%s2193_s24] ss:$0 sm:$0xff]  ;;  %s2875_s24 = sld [smem:[#allocation16_spill]] }
 0x1fc   :  { %v643_v51 = vpop.permute.xlu2 %642 }
 0x1fd   :  { %v649_v17 = vmul.f32 %v643_v51, %v2328_v10 }
 0x1ff   :  { %1981 = vset.pattern.permute.xlu0 %v2108_v3 }
 0x200   :  { %v717_v44 = vpop.permute.xlu1 %716  ;;  %v747_v62 = vpop.permute.xlu0 %746 }
 0x201   :  { %1979 = vset.pattern.permute.xlu1 %v2120_v23  ;;  %705 = vrot.lane.b32.xlu2 %v700_v39, %s2122_s5  ;;  %v720_v46 = vmul.f32 %v717_v44, %v2322_v8  ;;  %v750_v63 = vmul.f32 %v747_v62, %v2322_v8 }
 0x202   :  { %786 = vperm.xlu1 %1979, %v2322_v8  }
 0x203   :  { %725 = vrot.lane.b32.xlu0 %v720_v46, %s2123_s25 }
 0x204   :  { %v733_v56 = vpop.permute.xlu2 %732 }
 0x205   :  { %v739_v22 = vmul.f32 %v733_v56, %v2328_v10 }
 0x209   :  { %v797_v47 = vpop.permute.xlu1 %796  ;;  %755 = vrot.lane.b32.xlu2 %v750_v63, %s2122_s5 }
 0x20a   :  { %1980 = vset.pattern.permute.xlu1 %v2108_v3  ;;  %v800_v49 = vmul.f32 %v797_v47, %v2322_v8 }
 0x20c   :  { %805 = vrot.lane.b32.xlu1 %v800_v49, %s2122_s5 }
 0x211   :  { %775 = vrot.lane.b32.xlu2 %v770_v9, %s2123_s25 }
 0x212   :  { %v817_v50 = vpop.permute.xlu1 %816 }
 0x213   :  { %v820_v3 = vmul.f32 %v817_v50, %v2322_v8 }
 0x214   :  { %631 = vperm.xlu1 %1980, %v2328_v10  }
 0x215   :  { %825 = vrot.lane.b32.xlu0 %v820_v3, %s2123_s25 }
 0x219   :  { %653 = vrot.lane.b32.xlu2 %v649_v17, %s2122_s5 }
 0x21b   :  { %v683_v53 = vpop.permute.xlu1 %682 }
 0x21c   :  { %v689_v5 = vmul.f32 %v683_v53, %v2328_v10 }
 0x224   :  { %v663_v59 = vpop.permute.xlu1 %662 }
 0x225   :  { %v669_v61 = vmul.f32 %v663_v59, %v2328_v10 }
 0x227   :  { %v704_v1 = vpop.permute.xlu2 %703  ;;  %673 = vrot.lane.b32.xlu0 %v669_v61, %s2123_s25 }
 0x228   :  { %v709_v11 = vadd.f32 %v704_v1, %v689_v5 }
 0x22a   :  { %v482_v55 = vpop.f32.mrf.mxu0 }
 0x22b   :  { %v483_v57 = vadd.f32 %v2003_v52, %v482_v55 }
 0x22d   :  { %v494_v58 = vmax.f32 %v483_v57, 0.0  ;;  %v2004_v57 = vld [vmem:[%s2183_s14] ss:$0 sm:$0xff]  ;;  %s2872_s14 = sld [smem:[#allocation13_spill]] }
 0x22f   :  { %1837 = vmatmul.msk.f32.vlgmr.msra.gmra.mxu1 %vm204_vm10, %v494_v58  ;;  %636 = vperm.xlu0 %1981, %v2322_v8  }
 0x232   :  { %v485_v0 = vpop.f32.mrf.mxu0 }
 0x233   :  { %v486_v4 = vadd.f32 %v2003_v52, %v485_v0 }
 0x235   :  { %v495_v6 = vmax.f32 %v486_v4, 0.0 }
 0x237   :  { %1838 = vmatmul.msk.f32.gmra.mxu1 %vm204_vm10, %v495_v6  ;;  %2002 = vset.pattern.permute.xlu0 %v2114_v40  ;;  %v783_v40 = vpop.permute.xlu0 %782 }
 0x238   :  { %v789_v27 = vmul.f32 %v783_v40, %v2328_v10 }
 0x239   :  { %v724_v14 = vpop.permute.xlu2 %723 }
 0x23a   :  { %v488_v12 = vpop.f32.mrf.mxu0  ;;  %v729_v15 = vadd.f32 %v724_v14, %v709_v11 }
 0x23b   :  { %v489_v13 = vadd.f32 %v2003_v52, %v488_v12 }
 0x23c   :  { %833 = vrot.lane.b32.xlu1 %v729_v15, %s2124_s29 }
 0x23d   :  { %v496_v16 = vmax.f32 %v489_v13, 0.0 }
 0x23f   :  { %1839 = vmatmul.msk.f32.gmra.mxu1 %vm204_vm10, %v496_v16 }
 0x242   :  { %v491_v18 = vpop.f32.mrf.mxu0 }
 0x243   :  { %v492_v19 = vadd.f32 %v2003_v52, %v491_v18 }
 0x245   :  { %v497_v21 = vmax.f32 %v492_v19, 0.0 }
 0x247   :  { %1840 = vmatmul.msk.f32.gmra.mxu1 %vm204_vm10, %v497_v21 }
 0x248   :  { %v754_v23 = vpop.permute.xlu1 %753 }
 0x249   :  { %v759_v24 = vadd.f32 %v754_v23, %v739_v22 }
 0x24b   :  { %v774_v25 = vpop.permute.xlu2 %773 }
 0x24c   :  { %v779_v26 = vadd.f32 %v774_v25, %v759_v24  ;;  %v2507_v25 = vpop.f32.mrf.mxu2 }
 0x24e   :  { %841 = vrot.lane.b32.xlu2 %v779_v26, %s2125_s3  ;;  %v2511_v26 = vpop.f32.mrf.mxu3 }
 0x253   :  { %v687_v36 = vpop.permute.xlu2 %686 }
 0x254   :  { %v690_v43 = vmul.f32 %v687_v36, %v2322_v8  ;;  %v2515_v40 = vpop.f32.mrf.mxu2  ;;  %v1011_v36 = vld [vmem:[%s2228_s6 + $0x8] sm:$0xff] }
 0x25a   :  { %v804_v28 = vpop.permute.xlu1 %803 }
 0x25b   :  { %v809_v29 = vadd.f32 %v804_v28, %v789_v27  ;;  %v706_v41 = vpop.permute.xlu2 %705  ;;  %v1013_v27 = vld [vmem:[%s2228_s6 + $0x18] sm:$0xff]  ;;  %v1012_v28 = vld [vmem:[%s2228_s6 + $0x10] sm:$0xff]  ;;  %s2877_s6 = sld [smem:[#allocation11_spill]] }
 0x25c   :  { %v710_v46 = vadd.f32 %v706_v41, %v690_v43  ;;  %1042 = vmatpush.msra.mxu2 %v1013_v27  ;;  %v892_v27 = vld [vmem:[%s2198_s30 + $0x40] sm:$0xff] }
 0x25e   :  { %1043 = vmatpush.msra.mxu2 %v1012_v28  ;;  %v891_v28 = vld [vmem:[%s2198_s30 + $0x38] sm:$0xff] }
 0x260   :  { %1044 = vmatpush.msra.mxu2 %v1011_v36  ;;  %v890_v36 = vld [vmem:[%s2198_s30 + $0x30] sm:$0xff] }
 0x261   :  { %v824_v30 = vpop.permute.xlu0 %823 }
 0x262   :  { %v829_v31 = vadd.f32 %v824_v30, %v809_v29  ;;  %v647_v33 = vpop.permute.xlu1 %646  ;;  %v2521_v29 = vpop.f32.mrf.mxu3  ;;  %1045 = vmatpush.msra.mxu2 %v1010_v2  ;;  %v2597_v2 = vld [vmem:[%s2158_s21 + $0x18] sm:$0xff] }
 0x263   :  { %v650_v34 = vmul.f32 %v647_v33, %v2322_v8  ;;  %v756_v47 = vpop.permute.xlu2 %755  ;;  %v2523_v30 = vpop.f32.mrf.mxu2 }
 0x264   :  { %849 = vrot.lane.b32.xlu1 %v829_v31, %s2126_s8  ;;  %v2526_v31 = vld [vmem:[%s2158_s21 + $0x10] sm:$0xff] }
 0x265   :  { %655 = vrot.lane.b32.xlu2 %v650_v34, %s2122_s5 }
 0x269   :  { %v737_v42 = vpop.permute.xlu0 %736 }
 0x26a   :  { %v740_v48 = vmul.f32 %v737_v42, %v2322_v8  ;;  %v2530_v33 = vpop.f32.mrf.mxu3  ;;  %v212_v42 = vmax.f32 %v2461_v54, 1.0 }
 0x26b   :  { %v667_v37 = vpop.permute.xlu1 %666  ;;  %v776_v55 = vpop.permute.xlu2 %775 }
 0x26c   :  { %v670_v39 = vmul.f32 %v667_v37, %v2322_v8  ;;  %v760_v51 = vadd.f32 %v756_v47, %v740_v48  ;;  %v2532_v34 = vpop.f32.mrf.mxu2  ;;  %v211_v37 = vmax.f32 %v2433_v32, 1.0  ;;  %vm233_vm5 = vweird.f32 %v212_v42 }
 0x26e   :  { %675 = vrot.lane.b32.xlu1 %v670_v39, %s2123_s25  ;;  %v780_v56 = vadd.f32 %v776_v55, %v760_v51  ;;  %2015 = vrcp.f32 %v211_v37  ;;  %vm218_vm1 = vweird.f32 %v211_v37  ;;  %v222_v55 = vand.u32 2147483647, %v211_v37 }
 0x26f   :  { %2017 = vrcp.f32 %v212_v42 }
 0x270   :  { %843 = vrot.lane.b32.xlu0 %v780_v56, %s2125_s3  ;;  %vm223_vm4 = vcmp.eq.f32.partialorder %v222_v55, 8.507059e+37 }
 0x272   :  { %v2536_v35 = vpop.f32.mrf.mxu3 }
 0x273   :  { %v654_v16 = vpop.permute.xlu2 %653 }
 0x274   :  { %v787_v44 = vpop.permute.xlu1 %786  ;;  %v2016_v43 = vpop.eup %2015 }
 0x275   :  { %v726_v49 = vpop.permute.xlu0 %725  ;;  %v790_v50 = vmul.f32 %v787_v44, %v2322_v8  ;;  %v214_v47 = vmul.f32 %v2016_v43, %v211_v37  ;;  %vm219_vm2 = vweird.f32 %v2016_v43 }
 0x276   :  { %v730_v3 = vadd.f32 %v726_v49, %v710_v46  ;;  %v2018_v49 = vpop.eup %2017  ;;  %vm220_vm3 = vmor %vm218_vm1, %vm219_vm2 }
 0x277   :  { %v215_v48 = vsub.f32 1.0, %v214_v47  ;;  %v229_v51 = vmul.f32 %v2018_v49, %v212_v42  ;;  %vm234_vm6 = vweird.f32 %v2018_v49 }
 0x278   :  { %835 = vrot.lane.b32.xlu2 %v730_v3, %s2124_s29  ;;  %vm235_vm7 = vmor %vm233_vm5, %vm234_vm6 }
 0x279   :  { %v216_v32 = vmul.f32 %v2016_v43, %v215_v48 }
 0x27b   :  { %v217_v54 = vadd.f32 %v2016_v43, %v216_v32 }
 0x27e   :  { %v806_v52 = vpop.permute.xlu1 %805 }
 0x27f   :  { %v810_v53 = vadd.f32 %v806_v52, %v790_v50  ;;  %v224_v52 = vand.u32 2147483648, %v211_v37  ;;  %v889_v37 = vld [vmem:[%s2198_s30 + $0x28] sm:$0xff] }
 0x286   :  { %v632_v11 = vpop.permute.xlu1 %631 }
 0x287   :  { %v826_v58 = vpop.permute.xlu0 %825  ;;  %v639_v14 = vmul.f32 %v632_v11, %v2328_v10 }
 0x288   :  { %v830_v59 = vadd.f32 %v826_v58, %v810_v53  ;;  %v230_v53 = vsub.f32 1.0, %v229_v51  ;;  %v225_v58 = vor.u32 1.1754944e-38, %v224_v52 }
 0x289   :  { %v659_v17 = vadd.f32 %v654_v16, %v639_v14 }
 0x28a   :  { %851 = vrot.lane.b32.xlu1 %v830_v59, %s2126_s8  ;;  %v221_v59 = vsel %vm220_vm3, %v2016_v43, %v217_v54  ;;  %v884_v43 = vld [vmem:[%s2198_s30] sm:$0xff] }
 0x299   :  { %v674_v18 = vpop.permute.xlu0 %673 }
 0x29a   :  { %v679_v20 = vadd.f32 %v674_v18, %v659_v17 }
 0x2a8   :  { %v842_v22 = vpop.permute.xlu2 %841 }
 0x2ac   :  { %v535_v61 = vpop.f32.mrf.mxu1 }
 0x2ad   :  { %v536_v62 = vadd.f32 %v2004_v57, %v535_v61  ;;  %v231_v61 = vmul.f32 %v2018_v49, %v230_v53 }
 0x2ae   :  { %v834_v19 = vpop.permute.xlu1 %833 }
 0x2af   :  { %v547_v63 = vmax.f32 %v536_v62, 0.0  ;;  %v856_v21 = vsel %vm855_vm14, %v679_v20, %v834_v19  ;;  %v226_v62 = vsel %vm223_vm4, %v225_v58, %v221_v59  ;;  %v2019_v58 = vld [vmem:[%s2153_s17 + $0x8] sm:$0xff]  ;;  %s2873_s17 = sld [smem:[#allocation9_spill]] }
 0x2b0   :  { %v859_v23 = vsel %vm858_vm15, %v856_v21, %v842_v22 }
 0x2b1   :  { %1841 = vmatmul.msk.f32.vlgmr.msrb.gmra.mxu2 %vm204_vm10, %v547_v63  ;;  %v239_v63 = vand.u32 2147483648, %v212_v42 }
 0x2b4   :  { %v538_v0 = vpop.f32.mrf.mxu1 }
 0x2b5   :  { %v539_v1 = vadd.f32 %v2004_v57, %v538_v0  ;;  %v232_v0 = vadd.f32 %v2018_v49, %v231_v61 }
 0x2b7   :  { %v548_v4 = vmax.f32 %v539_v1, 0.0  ;;  %v237_v1 = vand.u32 2147483647, %v212_v42  ;;  %v885_v42 = vld [vmem:[%s2198_s30 + $0x8] sm:$0xff] }
 0x2b9   :  { %1842 = vmatmul.msk.f32.gmra.mxu2 %vm204_vm10, %v548_v4  ;;  %v2554_v4 = vmul.f32 %v2378_v45, %v226_v62  ;;  %vm238_vm8 = vcmp.eq.f32.partialorder %v237_v1, 8.507059e+37 }
 0x2bc   :  { %v541_v5 = vpop.f32.mrf.mxu1 }
 0x2bd   :  { %v542_v6 = vadd.f32 %v2004_v57, %v541_v5  ;;  %v240_v5 = vor.u32 1.1754944e-38, %v239_v63 }
 0x2bf   :  { %v549_v9 = vmax.f32 %v542_v6, 0.0  ;;  %v236_v6 = vsel %vm235_vm7, %v2018_v49, %v232_v0 }
 0x2c1   :  { %1843 = vmatmul.msk.f32.gmra.mxu2 %vm204_vm10, %v549_v9  ;;  %v241_v9 = vsel %vm238_vm8, %v240_v5, %v236_v6 }
 0x2c2   :  { %v2559_v11 = vmul.f32 %v2401_v60, %v241_v9 }
 0x2c4   :  { %v544_v12 = vpop.f32.mrf.mxu1 }
 0x2c5   :  { %v545_v13 = vadd.f32 %v2004_v57, %v544_v12  ;;  %v637_v12 = vpop.permute.xlu0 %636 }
 0x2c6   :  { %v640_v45 = vmul.f32 %v637_v12, %v2322_v8  ;;  %v2571_v8 = vld [vmem:[%s2158_s21] sm:$0xff] }
 0x2c7   :  { %v550_v15 = vmax.f32 %v545_v13, 0.0  ;;  %v656_v13 = vpop.permute.xlu2 %655 }
 0x2c8   :  { %v660_v14 = vadd.f32 %v656_v13, %v640_v45 }
 0x2c9   :  { %1844 = vmatmul.msk.f32.gmra.mxu2 %vm204_vm10, %v550_v15 }
 0x2d2   :  { %v836_v17 = vpop.permute.xlu2 %835 }
 0x2d6   :  { %v850_v10 = vpop.permute.xlu1 %849 }
 0x2d7   :  { %v862_v24 = vsel %vm861_vm0, %v859_v23, %v850_v10  ;;  %v2578_v10 = vld [vmem:[%s2158_s21 + $0x8] sm:$0xff]  ;;  %s2871_s21 = sld [smem:[#allocation14_spill]] }
 0x2d8   :  { %874 = vrot.lane.b32.xlu0 %v862_v24, %s2110_s0  ;;  %v893_v24 = vld [vmem:[%s2198_s30 + $0x48] sm:$0xff] }
 0x2dd   :  { %v1066_v49 = vld [vmem:[%s2871_s21 + $0x18] sm:$0xff]  ;;  %v1064_v32 = vld [vmem:[%s2871_s21 + $0x8] sm:$0xff]  ;;  %v1063_v51 = vld [vmem:[%s2871_s21] sm:$0xff] }
 0x2e0   :  { %1258 = vrot.lane.b32.xlu0 %v2507_v25, %s2122_s5  ;;  %v676_v15 = vpop.permute.xlu1 %675 }
 0x2e1   :  { %v680_v16 = vadd.f32 %v676_v15, %v660_v14 }
 0x2e2   :  { %v844_v60 = vpop.permute.xlu0 %843 }
 0x2e3   :  { %v857_v19 = vsel %vm855_vm14, %v680_v16, %v836_v17 }
 0x2e4   :  { %v860_v21 = vsel %vm858_vm15, %v857_v19, %v844_v60 }
 0x2e8   :  { %1347 = vrot.lane.b32.xlu0 %v2511_v26, %s2122_s5 }
 0x2f0   :  { %1337 = vrot.lane.b32.xlu0 %v2515_v40, %s2123_s25 }
 0x2f8   :  { %1274 = vrot.lane.b32.xlu0 %v2526_v31, %s2124_s29 }
 0x2fc   :  { %v852_v20 = vpop.permute.xlu1 %851 }
 0x2fd   :  { %v863_v23 = vsel %vm861_vm0, %v860_v21, %v852_v20 }
 0x300   :  { %1264 = vrot.lane.b32.xlu0 %v2532_v34, %s2122_s5 }
 0x308   :  { %1353 = vrot.lane.b32.xlu0 %v2536_v35, %s2122_s5 }
 0x310   :  { %1171 = vrot.lane.b32.xlu0 %v2521_v29, %s2124_s29 }
 0x318   :  { %1189 = vrot.lane.b32.xlu0 %v2526_v31, %s2125_s3 }
 0x334   :  { %v588_v39 = vpop.f32.mrf.mxu2 }
 0x335   :  { %v589_v41 = vadd.f32 %v2005_v38, %v588_v39  ;;  %v887_v39 = vld [vmem:[%s2198_s30 + $0x18] sm:$0xff] }
 0x337   :  { %1853 = vmatmul.msk.f32.vlgmr.msra.gmra.mxu2 %vm204_vm10, %v589_v41 }
 0x33c   :  { %v591_v44 = vpop.f32.mrf.mxu2 }
 0x33d   :  { %v592_v46 = vadd.f32 %v2005_v38, %v591_v44 }
 0x33f   :  { %1854 = vmatmul.msk.f32.gmra.mxu2 %vm204_vm10, %v592_v46 }
 0x344   :  { %v594_v50 = vpop.f32.mrf.mxu2 }
 0x345   :  { %v595_v3 = vadd.f32 %v2005_v38, %v594_v50  ;;  %v1065_v50 = vld [vmem:[%s2871_s21 + $0x10] sm:$0xff] }
 0x347   :  { %1855 = vmatmul.msk.f32.gmra.mxu2 %vm204_vm10, %v595_v3 }
 0x34c   :  { %v597_v56 = vpop.f32.mrf.mxu2 }
 0x34d   :  { %v598_v57 = vadd.f32 %v2005_v38, %v597_v56  ;;  %v888_v38 = vld [vmem:[%s2198_s30 + $0x20] sm:$0xff] }
 0x34f   :  { %618 = vmatpush.msrb.mxu3 %v598_v57  ;;  %1856 = vmatmul.msk.f32.gmra.mxu2 %vm204_vm10, %v598_v57  ;;  %v2006_v57 = vld [vmem:[%s2872_s14] ss:$0 sm:$0xff] }
 0x351   :  { %619 = vmatpush.msrb.mxu3 %v595_v3  ;;  %v2631_v3 = vld [vmem:[%s2288_s12 + $0x8] sm:$0xf] }
 0x352   :  { %1870 = vmatpush.msk.msrb.mxu2 %vm1217_vm11, %v2631_v3 }
 0x353   :  { %620 = vmatpush.msrb.mxu3 %v592_v46  ;;  %v875_v46 = vpop.permute.xlu0 %874 }
 0x355   :  { %621 = vmatpush.msrb.mxu3 %v589_v41  ;;  %v886_v41 = vld [vmem:[%s2198_s30 + $0x10] sm:$0xff]  ;;  %s2876_s30 = sld [smem:[#allocation15_spill]] }
 0x356   :  { %1845 = vmatmul.msk.f32.vlgmr.msrb.gmra.mxu3 %vm204_vm10, %v2554_v4 }
 0x357   :  { %911 = vmatpush.msra.mxu3 %v893_v24 }
 0x359   :  { %912 = vmatpush.msra.mxu3 %v892_v27 }
 0x35b   :  { %913 = vmatpush.msra.mxu3 %v891_v28  ;;  %v1259_v53 = vpop.permute.xlu0 %1258 }
 0x35c   :  { %v1282_v1 = vsel %vm855_vm14, %v1259_v53, %v2511_v26 }
 0x35d   :  { %914 = vmatpush.msra.mxu3 %v890_v36  ;;  %v933_v36 = vld [vmem:[%s2873_s17 + $0x18] sm:$0xff] }
 0x35e   :  { %1846 = vmatmul.msk.f32.gmra.mxu3 %vm204_vm10, %v2559_v11  ;;  %956 = vmatpush.msra.mxu0 %v933_v36 }
 0x35f   :  { %915 = vmatpush.msra.mxu3 %v889_v37 }
 0x361   :  { %916 = vmatpush.msra.mxu3 %v888_v38 }
 0x363   :  { %917 = vmatpush.msra.mxu3 %v887_v39  ;;  %v1348_v62 = vpop.permute.xlu0 %1347 }
 0x365   :  { %918 = vmatpush.msra.mxu3 %v886_v41 }
 0x367   :  { %919 = vmatpush.msra.mxu3 %v885_v42 }
 0x369   :  { %920 = vmatpush.msra.mxu3 %v884_v43 }
 0x36b   :  { %1095 = vmatpush.msrb.mxu3 %v1066_v49  ;;  %v1338_v45 = vpop.permute.xlu0 %1337 }
 0x36d   :  { %1096 = vmatpush.msrb.mxu3 %v1065_v50 }
 0x36f   :  { %1097 = vmatpush.msrb.mxu3 %v1064_v32 }
 0x371   :  { %1098 = vmatpush.msrb.mxu3 %v1063_v51  ;;  %v931_v51 = vld [vmem:[%s2873_s17 + $0x8] sm:$0xff] }
 0x373   :  { %v1275_v21 = vpop.permute.xlu0 %1274 }
 0x37b   :  { %v1265_v37 = vpop.permute.xlu0 %1264 }
 0x37c   :  { %v1285_v38 = vsel %vm855_vm14, %v1265_v37, %v2536_v35 }
 0x383   :  { %v1354_v49 = vpop.permute.xlu0 %1353 }
 0x3ba   :  { %v1047_v54 = vpop.f32.mrf.mxu2 }
 0x3bb   :  { %v1048_v63 = vadd.f32 %v2006_v57, %v1047_v54 }
 0x3bd   :  { %v1059_v6 = vmax.f32 %v1048_v63, 0.0 }
 0x3c2   :  { %v1050_v0 = vpop.f32.mrf.mxu2 }
 0x3c3   :  { %v1051_v13 = vadd.f32 %v2006_v57, %v1050_v0  ;;  %v2008_v0 = vld [vmem:[%s2876_s30] ss:$0 sm:$0xff] }
 0x3c5   :  { %v1060_v16 = vmax.f32 %v1051_v13, 0.0 }
 0x3ca   :  { %v1053_v14 = vpop.f32.mrf.mxu2 }
 0x3cb   :  { %v1054_v19 = vadd.f32 %v2006_v57, %v1053_v14 }
 0x3d9   :  { %v623_v18 = vpop.f32.mrf.mxu3 }
 0x3da   :  { %866 = vrot.lane.b32.xlu2 %v623_v18, %s2112_s9 }
 0x3e1   :  { %v626_v22 = vpop.f32.mrf.mxu3 }
 0x3e2   :  { %868 = vrot.lane.b32.xlu1 %v626_v22, %s2112_s9  ;;  %876 = vrot.lane.b32.xlu2 %v863_v23, %s2110_s0  ;;  %v1061_v22 = vmax.f32 %v1054_v19, 0.0  ;;  %v1056_v23 = vpop.f32.mrf.mxu2  ;;  %v971_v19 = vld [vmem:[%s2877_s6 + $0x10] sm:$0xff] }
 0x3ea   :  { %1270 = vrot.lane.b32.xlu1 %v2571_v8, %s2124_s29  ;;  %1335 = vrot.lane.b32.xlu2 %v2507_v25, %s2123_s25 }
 0x3f2   :  { %1260 = vrot.lane.b32.xlu1 %v2515_v40, %s2122_s5  ;;  %1272 = vrot.lane.b32.xlu2 %v2578_v10, %s2124_s29 }
 0x3fa   :  { %1349 = vrot.lane.b32.xlu1 %v2521_v29, %s2122_s5  ;;  %1262 = vrot.lane.b32.xlu2 %v2523_v30, %s2122_s5 }
 0x402   :  { %1339 = vrot.lane.b32.xlu1 %v2523_v30, %s2123_s25  ;;  %1351 = vrot.lane.b32.xlu2 %v2530_v33, %s2122_s5 }
 0x40a   :  { %1276 = vrot.lane.b32.xlu1 %v2597_v2, %s2124_s29  ;;  %1341 = vrot.lane.b32.xlu2 %v2532_v34, %s2123_s25 }
 0x412   :  { %1169 = vrot.lane.b32.xlu1 %v2511_v26, %s2124_s29  ;;  %1185 = vrot.lane.b32.xlu2 %v2571_v8, %s2125_s3 }
 0x41a   :  { %1187 = vrot.lane.b32.xlu1 %v2578_v10, %s2125_s3  ;;  %1173 = vrot.lane.b32.xlu2 %v2530_v33, %s2124_s29 }
 0x422   :  { %1175 = vrot.lane.b32.xlu1 %v2536_v35, %s2124_s29  ;;  %1191 = vrot.lane.b32.xlu2 %v2597_v2, %s2125_s3 }
 0x434   :  { %v867_v44 = vpop.permute.xlu2 %866 }
 0x435   :  { %v880_v47 = vsel %vm204_vm10, %v2317_v7, %v867_v44  ;;  %v2637_v7 = vld [vmem:[%s2288_s12] sm:$0xff]  ;;  %s2878_s12 = sld [smem:[#allocation10_spill]] }
 0x436   :  { %v2624_v48 = vsel %vm434_vm12, %v880_v47, %v875_v46  ;;  %1317 = vmatpush.msrb.mxu2 %v2637_v7 }
 0x437   :  { %1847 = vmatmul.msk.f32.vlgmr.msra.gmra.mxu3 %vm898_vm9, %v2624_v48 }
 0x438   :  { %1875 = vmatpush.msk.msra.mxu3 %vm1217_vm11, %v2631_v3 }
 0x43a   :  { %1394 = vmatpush.msra.mxu3 %v2637_v7 }
 0x43c   :  { %v877_v52 = vpop.permute.xlu2 %876 }
 0x444   :  { %v1336_v55 = vpop.permute.xlu2 %1335 }
 0x44c   :  { %v1273_v12 = vpop.permute.xlu2 %1272 }
 0x454   :  { %v869_v56 = vpop.permute.xlu1 %868  ;;  %v1263_v26 = vpop.permute.xlu2 %1262 }
 0x455   :  { %v881_v59 = vsel %vm204_vm10, %v2019_v58, %v869_v56  ;;  %v1284_v60 = vsel %vm855_vm14, %v1263_v26, %v2530_v33  ;;  %v1359_v33 = vsel %vm855_vm14, %v1336_v55, %v1348_v62  ;;  %v1119_v56 = vld [vmem:[%s2875_s24 + $0x18] sm:$0xff]  ;;  %v1116_v58 = vld [vmem:[%s2875_s24] sm:$0xff] }
 0x456   :  { %v2648_v61 = vsel %vm434_vm12, %v881_v59, %v877_v52  ;;  %v1288_v24 = vsel %vm858_vm15, %v1284_v60, %v1275_v21  ;;  %v1363_v42 = vsel %vm858_vm15, %v1359_v33, %v2571_v8  ;;  %v2007_v52 = vld [vmem:[%s2874_s19] ss:$0 sm:$0xff]  ;;  %v970_v60 = vld [vmem:[%s2877_s6 + $0x8] sm:$0xff] }
 0x457   :  { %1848 = vmatmul.msk.f32.gmra.mxu3 %vm898_vm9, %v2648_v61  ;;  %v2009_v21 = vld [vmem:[%s2878_s12] ss:$0 sm:$0xff] }
 0x45c   :  { %v1271_v5 = vpop.permute.xlu1 %1270  ;;  %v1352_v44 = vpop.permute.xlu2 %1351 }
 0x45d   :  { %v1286_v9 = vsel %vm858_vm15, %v1282_v1, %v1271_v5 }
 0x45e   :  { %1871 = vmatmul.msk.f32.vlgmr.msrb.gmra.mxu2 %vm861_vm0, %v1286_v9 }
 0x45f   :  { %1857 = vmatmul.msk.f32.vlgmr.msrb.gmra.mxu3 %vm204_vm10, %v1059_v6 }
 0x464   :  { %v1261_v15 = vpop.permute.xlu1 %1260  ;;  %v1342_v47 = vpop.permute.xlu2 %1341 }
 0x465   :  { %v1283_v17 = vsel %vm855_vm14, %v1261_v15, %v2521_v29  ;;  %v1057_v29 = vadd.f32 %v2006_v57, %v1056_v23  ;;  %v1362_v50 = vsel %vm855_vm14, %v1342_v47, %v1354_v49  ;;  %v1117_v57 = vld [vmem:[%s2875_s24 + $0x8] sm:$0xff]  ;;  %v2010_v49 = vld [vmem:[%s2880_s10] ss:$0 sm:$0xff] }
 0x466   :  { %v1287_v18 = vsel %vm858_vm15, %v1283_v17, %v1273_v12  ;;  %v1366_v32 = vsel %vm858_vm15, %v1362_v50, %v2597_v2  ;;  %v1118_v2 = vld [vmem:[%s2875_s24 + $0x10] sm:$0xff]  ;;  %v972_v17 = vld [vmem:[%s2877_s6 + $0x18] sm:$0xff]  ;;  %v1476_v50 = vld [vmem:[%s2879_s7] sm:$0xff] }
 0x467   :  { %1858 = vmatmul.msk.f32.gmra.mxu3 %vm204_vm10, %v1060_v16  ;;  %1872 = vmatmul.msk.f32.gmra.mxu2 %vm861_vm0, %v1287_v18  ;;  %v1062_v28 = vmax.f32 %v1057_v29, 0.0  ;;  %v1485_v29 = vld [vmem:[%s2879_s7 + $0x48] sm:$0xff] }
 0x468   :  { %995 = vmatpush.msrb.mxu1 %v972_v17 }
 0x46a   :  { %996 = vmatpush.msrb.mxu1 %v971_v19 }
 0x46c   :  { %v1350_v20 = vpop.permute.xlu1 %1349  ;;  %997 = vmatpush.msrb.mxu1 %v970_v60  ;;  %v1186_v47 = vpop.permute.xlu2 %1185 }
 0x46d   :  { %v1360_v43 = vsel %vm855_vm14, %v1338_v45, %v1350_v20  ;;  %v969_v20 = vld [vmem:[%s2877_s6] sm:$0xff] }
 0x46e   :  { %v1364_v46 = vsel %vm858_vm15, %v1360_v43, %v2578_v10  ;;  %v932_v10 = vld [vmem:[%s2873_s17 + $0x10] sm:$0xff]  ;;  %998 = vmatpush.msrb.mxu1 %v969_v20 }
 0x46f   :  { %1859 = vmatmul.msk.f32.gmra.mxu3 %vm204_vm10, %v1061_v22  ;;  %1873 = vmatmul.msk.f32.gmra.mxu2 %vm861_vm0, %v1288_v24 }
 0x470   :  { %957 = vmatpush.msra.mxu0 %v932_v10  ;;  %1865 = vmatpush.msk.msra.mxu1 %vm1217_vm11, %v2631_v3  ;;  %v1482_v3 = vld [vmem:[%s2879_s7 + $0x30] sm:$0xff] }
 0x472   :  { %958 = vmatpush.msra.mxu0 %v931_v51  ;;  %1236 = vmatpush.msra.mxu1 %v2637_v7  ;;  %v1481_v7 = vld [vmem:[%s2879_s7 + $0x28] sm:$0xff]  ;;  %v1172_v51 = vpop.permute.xlu0 %1171 }
 0x474   :  { %v1340_v27 = vpop.permute.xlu1 %1339 }
 0x475   :  { %v1361_v35 = vsel %vm855_vm14, %v1340_v27, %v1352_v44  ;;  %v1484_v27 = vld [vmem:[%s2879_s7 + $0x40] sm:$0xff]  ;;  %v1478_v44 = vld [vmem:[%s2879_s7 + $0x10] sm:$0xff] }
 0x476   :  { %v1365_v8 = vsel %vm858_vm15, %v1361_v35, %v2526_v31  ;;  %v930_v31 = vld [vmem:[%s2873_s17] sm:$0xff] }
 0x477   :  { %1860 = vmatmul.msk.f32.gmra.mxu3 %vm204_vm10, %v1062_v28  ;;  %959 = vmatpush.msra.mxu0 %v930_v31  ;;  %v1483_v28 = vld [vmem:[%s2879_s7 + $0x38] sm:$0xff] }
 0x479   :  { %1148 = vmatpush.msrb.mxu0 %v1119_v56 }
 0x47b   :  { %1149 = vmatpush.msrb.mxu0 %v1118_v2 }
 0x47c   :  { %v1277_v39 = vpop.permute.xlu1 %1276 }
 0x47d   :  { %v1289_v41 = vsel %vm858_vm15, %v1285_v38, %v1277_v39  ;;  %1150 = vmatpush.msrb.mxu0 %v1117_v57  ;;  %v1480_v38 = vld [vmem:[%s2879_s7 + $0x20] sm:$0xff] }
 0x47e   :  { %1874 = vmatmul.msk.f32.gmra.mxu2 %vm861_vm0, %v1289_v41  ;;  %v1479_v41 = vld [vmem:[%s2879_s7 + $0x18] sm:$0xff] }
 0x47f   :  { %1876 = vmatmul.msk.f32.vlgmr.msra.gmra.mxu3 %vm861_vm0, %v1363_v42  ;;  %1151 = vmatpush.msrb.mxu0 %v1116_v58 }
 0x484   :  { %v1170_v42 = vpop.permute.xlu1 %1169 }
 0x485   :  { %v1197_v35 = vsel %vm855_vm14, %v2507_v25, %v1170_v42  ;;  %v1198_v25 = vsel %vm855_vm14, %v2515_v40, %v1172_v51 }
 0x487   :  { %1877 = vmatmul.msk.f32.gmra.mxu3 %vm861_vm0, %v1364_v46 }
 0x48f   :  { %1878 = vmatmul.msk.f32.gmra.mxu3 %vm861_vm0, %v1365_v8  ;;  %v1477_v8 = vld [vmem:[%s2879_s7 + $0x8] sm:$0xff] }
 0x497   :  { %1879 = vmatmul.msk.f32.gmra.mxu3 %vm861_vm0, %v1366_v32  ;;  %v1201_v32 = vsel %vm858_vm15, %v1197_v35, %v1186_v47 }
 0x4ba   :  { %v922_v53 = vpop.f32.mrf.mxu3 }
 0x4bb   :  { %v923_v54 = vadd.f32 %v2007_v52, %v922_v53 }
 0x4bd   :  { %v928_v55 = vmax.f32 %v923_v54, 0.0  ;;  %v1188_v54 = vpop.permute.xlu1 %1187 }
 0x4be   :  { %v1202_v57 = vsel %vm858_vm15, %v1198_v25, %v1188_v54 }
 0x4bf   :  { %1849 = vmatmul.msk.f32.vlgmr.msra.gmra.mxu0 %vm204_vm10, %v928_v55 }
 0x4da   :  { %v925_v59 = vpop.f32.mrf.mxu3 }
 0x4db   :  { %v926_v62 = vadd.f32 %v2007_v52, %v925_v59  ;;  %v1174_v59 = vpop.permute.xlu2 %1173 }
 0x4dd   :  { %v929_v63 = vmax.f32 %v926_v62, 0.0 }
 0x4df   :  { %1850 = vmatmul.msk.f32.gmra.mxu0 %vm204_vm10, %v929_v63 }
 0x4e1   :  { %v1319_v43 = vpop.f32.mrf.mxu2 }
 0x4e2   :  { %v1100_v1 = vpop.f32.mrf.mxu3 }
 0x4e3   :  { %v1101_v5 = vadd.f32 %v2008_v0, %v1100_v1  ;;  %v1190_v1 = vpop.permute.xlu0 %1189 }
 0x4e5   :  { %v1112_v6 = vmax.f32 %v1101_v5, 0.0 }
 0x4e7   :  { %1861 = vmatmul.msk.f32.vlgmr.msrb.gmra.mxu0 %vm204_vm10, %v1112_v6  ;;  %v1176_v6 = vpop.permute.xlu1 %1175 }
 0x4ea   :  { %v1103_v9 = vpop.f32.mrf.mxu3  ;;  %v1322_v52 = vpop.f32.mrf.mxu2 }
 0x4eb   :  { %v1104_v12 = vadd.f32 %v2008_v0, %v1103_v9 }
 0x4ed   :  { %v1113_v13 = vmax.f32 %v1104_v12, 0.0  ;;  %v2747_v12 = vld [vmem:[%s2148_s13] sm:$0xff] }
 0x4ef   :  { %1862 = vmatmul.msk.f32.gmra.mxu0 %vm204_vm10, %v1113_v13 }
 0x4f2   :  { %v1106_v45 = vpop.f32.mrf.mxu3  ;;  %v1325_v40 = vpop.f32.mrf.mxu2 }
 0x4f3   :  { %v1107_v14 = vadd.f32 %v2008_v0, %v1106_v45  ;;  %v1200_v45 = vsel %vm855_vm14, %v2532_v34, %v1176_v6  ;;  %v2758_v34 = vld [vmem:[%s2148_s13 + $0x8] sm:$0xff]  ;;  %s2882_s13 = sld [smem:[#allocation20_spill]] }
 0x4f5   :  { %v1114_v15 = vmax.f32 %v1107_v14, 0.0  ;;  %v1192_v14 = vpop.permute.xlu2 %1191 }
 0x4f6   :  { %v1204_v60 = vsel %vm858_vm15, %v1200_v45, %v1192_v14  ;;  %v1556_v45 = vld [vmem:[%s2884_s16 + $0x10] sm:$0xff]  ;;  %v1554_v14 = vld [vmem:[%s2884_s16] sm:$0xff] }
 0x4f7   :  { %1863 = vmatmul.msk.f32.gmra.mxu0 %vm204_vm10, %v1114_v15 }
 0x4fa   :  { %v1109_v16 = vpop.f32.mrf.mxu3 }
 0x4fb   :  { %v1110_v18 = vadd.f32 %v2008_v0, %v1109_v16  ;;  %v1199_v0 = vsel %vm855_vm14, %v2523_v30, %v1174_v59  ;;  %v1516_v59 = vld [vmem:[%s2882_s13 + $0x8] sm:$0xff] }
 0x4fc   :  { %v1203_v5 = vsel %vm858_vm15, %v1199_v0, %v1190_v1  ;;  %v2012_v0 = vld [vmem:[%s2883_s15] ss:$0 sm:$0xff] }
 0x4fd   :  { %v1115_v26 = vmax.f32 %v1110_v18, 0.0 }
 0x4ff   :  { %1864 = vmatmul.msk.f32.gmra.mxu0 %vm204_vm10, %v1115_v26 }
 0x501   :  { %v1328_v15 = vpop.f32.mrf.mxu2 }
 0x502   :  { %v2719_v39 = vpop.f32.mrf.mxu3 }
 0x50a   :  { %v1399_v10 = vpop.f32.mrf.mxu3 }
 0x512   :  { %v1402_v62 = vpop.f32.mrf.mxu3 }
 0x51a   :  { %v1405_v16 = vpop.f32.mrf.mxu3 }
 0x53c   :  { %v961_v22 = vpop.f32.mrf.mxu0 }
 0x53d   :  { %v962_v23 = vadd.f32 %v2009_v21, %v961_v22 }
 0x53f   :  { %v967_v24 = vmax.f32 %v962_v23, 0.0 }
 0x541   :  { %1851 = vmatmul.msk.f32.vlgmr.msrb.gmra.mxu1 %vm204_vm10, %v967_v24 }
 0x542   :  { %1496 = vmatpush.msrb.mxu1 %v1485_v29  ;;  %v2011_v29 = vld [vmem:[%s2881_s11] ss:$0 sm:$0xff] }
 0x544   :  { %1497 = vmatpush.msrb.mxu1 %v1484_v27 }
 0x546   :  { %1498 = vmatpush.msrb.mxu1 %v1483_v28 }
 0x548   :  { %1499 = vmatpush.msrb.mxu1 %v1482_v3 }
 0x54a   :  { %1500 = vmatpush.msrb.mxu1 %v1481_v7 }
 0x54c   :  { %1501 = vmatpush.msrb.mxu1 %v1480_v38 }
 0x54e   :  { %1502 = vmatpush.msrb.mxu1 %v1479_v41 }
 0x550   :  { %1503 = vmatpush.msrb.mxu1 %v1478_v44 }
 0x552   :  { %1504 = vmatpush.msrb.mxu1 %v1477_v8 }
 0x554   :  { %1505 = vmatpush.msrb.mxu1 %v1476_v50 }
 0x55c   :  { %v964_v36 = vpop.f32.mrf.mxu0 }
 0x55d   :  { %v965_v37 = vadd.f32 %v2009_v21, %v964_v36 }
 0x55f   :  { %v968_v33 = vmax.f32 %v965_v37, 0.0 }
 0x561   :  { %1852 = vmatmul.msk.f32.gmra.mxu1 %vm204_vm10, %v968_v33 }
 0x564   :  { %v1153_v46 = vpop.f32.mrf.mxu0 }
 0x565   :  { %v2731_v31 = vadd.f32 %v2010_v49, %v1153_v46 }
 0x567   :  { %v1331_v56 = vmul.f32 %v1319_v43, %v2731_v31  ;;  %v1408_v23 = vmul.f32 %v2719_v39, %v2731_v31 }
 0x569   :  { %1866 = vmatmul.msk.f32.vlgmr.msra.gmra.mxu1 %vm861_vm0, %v1201_v32 }
 0x56c   :  { %v1156_v53 = vpop.f32.mrf.mxu0 }
 0x56d   :  { %v2733_v55 = vadd.f32 %v2010_v49, %v1156_v53 }
 0x56f   :  { %v1332_v2 = vmul.f32 %v1322_v52, %v2733_v55  ;;  %v1409_v22 = vmul.f32 %v1399_v10, %v2733_v55 }
 0x571   :  { %1867 = vmatmul.msk.f32.gmra.mxu1 %vm861_vm0, %v1202_v57  ;;  %v1992_v58 = vpack.i.bf16 %v1331_v56, %v1332_v2  ;;  %v1997_v24 = vpack.i.bf16 %v1408_v23, %v1409_v22 }
 0x573   :  { %1993 = vrot.lane.b32.xlu2 %v1992_v58, %s2124_s29  ;;  %v1518_v58 = vld [vmem:[%s2882_s13 + $0x18] sm:$0xff] }
 0x574   :  { %v1159_v63 = vpop.f32.mrf.mxu0 }
 0x575   :  { %v1160_v9 = vadd.f32 %v2010_v49, %v1159_v63 }
 0x577   :  { %v1333_v17 = vmul.f32 %v1325_v40, %v1160_v9  ;;  %v1410_v18 = vmul.f32 %v1402_v62, %v1160_v9  ;;  %v1515_v62 = vld [vmem:[%s2882_s13] sm:$0xff] }
 0x579   :  { %1868 = vmatmul.msk.f32.gmra.mxu1 %vm861_vm0, %v1203_v5 }
 0x57b   :  { %1671 = vrot.lane.b32.xlu2 %v2747_v12, %s2123_s25 }
 0x57c   :  { %v1162_v13 = vpop.f32.mrf.mxu0 }
 0x57d   :  { %v1163_v30 = vadd.f32 %v2010_v49, %v1162_v13  ;;  %v1557_v13 = vld [vmem:[%s2884_s16 + $0x18] sm:$0xff] }
 0x57e   :  { %1580 = vmatpush.msra.mxu1 %v1557_v13 }
 0x57f   :  { %v1334_v26 = vmul.f32 %v1328_v15, %v1163_v30  ;;  %v1411_v19 = vmul.f32 %v1405_v16, %v1163_v30 }
 0x580   :  { %1581 = vmatpush.msra.mxu1 %v1556_v45 }
 0x581   :  { %1869 = vmatmul.msk.f32.gmra.mxu1 %vm861_vm0, %v1204_v60  ;;  %v1982_v20 = vpack.i.bf16 %v1333_v17, %v1334_v26  ;;  %v1987_v21 = vpack.i.bf16 %v1410_v18, %v1411_v19  ;;  %v2013_v19 = vld [vmem:[%s2885_s18] ss:$0 sm:$0xff] }
 0x583   :  { %1983 = vrot.lane.b32.xlu0 %v1982_v20, %s2124_s29  ;;  %1988 = vrot.lane.b32.xlu1 %v1987_v21, %s2125_s3 }
 0x584   :  { %1673 = vrot.lane.b32.xlu2 %v2758_v34, %s2123_s25 }
 0x589   :  { %1882 = vmatmul.msk.f32.vlgmr.msrb.gmra.mxu1 %vm898_vm9, %v2624_v48 }
 0x58b   :  { %1998 = vrot.lane.b32.xlu0 %v1997_v24, %s2125_s3  ;;  %1632 = vrot.lane.b32.xlu1 %v2747_v12, %s2122_s5 }
 0x591   :  { %1883 = vmatmul.msk.f32.gmra.mxu1 %vm898_vm9, %v2648_v61 }
 0x593   :  { %1634 = vrot.lane.b32.xlu1 %v2758_v34, %s2122_s5 }
 0x5be   :  { %v1000_v27 = vpop.f32.mrf.mxu1 }
 0x5bf   :  { %v1001_v28 = vadd.f32 %v2011_v29, %v1000_v27 }
 0x5c1   :  { %1006 = vst.msk [vmem:[#allocation4] sm:$0xff] %vm204_vm10, %v1001_v28 }
 0x5cd   :  { %v1994_v46 = vpop.permute.xlu2 %1993 }
 0x5ce   :  { %v1995_v51 = vunpack.i.l.bf16 %v1994_v46 }
 0x5de   :  { %v1003_v36 = vpop.f32.mrf.mxu1 }
 0x5df   :  { %v1004_v3 = vadd.f32 %v2011_v29, %v1003_v36  ;;  %v1672_v29 = vpop.permute.xlu2 %1671 }
 0x5e1   :  { %1007 = vst.msk [vmem:[#allocation4 + $0x8] sm:$0xff] %vm204_vm10, %v1004_v3 }
 0x5e6   :  { %v1238_v48 = vpop.f32.mrf.mxu1 }
 0x5e7   :  { %v1250_v52 = vmul.f32 %v1238_v48, %v2731_v31  ;;  %v1517_v31 = vld [vmem:[%s2882_s13 + $0x10] sm:$0xff]  ;;  %v1674_v27 = vpop.permute.xlu2 %1673 }
 0x5ee   :  { %v1241_v37 = vpop.f32.mrf.mxu1 }
 0x5ef   :  { %v1251_v8 = vmul.f32 %v1241_v37, %v2733_v55  ;;  %v1996_v55 = vunpack.i.h.bf16 %v1994_v46 }
 0x5f1   :  { %v1445_v25 = vsel %vm855_vm14, %v1251_v8, %v1995_v51  ;;  %v1444_v2 = vsel %vm855_vm14, %v1250_v52, %v1996_v55 }
 0x5f5   :  { %v1984_v7 = vpop.permute.xlu0 %1983  ;;  %v1989_v39 = vpop.permute.xlu1 %1988 }
 0x5f6   :  { %v1244_v33 = vpop.f32.mrf.mxu1  ;;  %v1986_v38 = vunpack.i.h.bf16 %v1984_v7  ;;  %v1985_v42 = vunpack.i.l.bf16 %v1984_v7  ;;  %v1990_v35 = vunpack.i.l.bf16 %v1989_v39  ;;  %v1991_v50 = vunpack.i.h.bf16 %v1989_v39 }
 0x5f7   :  { %v1252_v41 = vmul.f32 %v1244_v33, %v1160_v9  ;;  %v1475_v9 = vld [vmem:[%s2293_s20] sm:$0xff]  ;;  %s2886_s20 = sld [smem:[#allocation23_spill]] }
 0x5f8   :  { %1661 = vmatpush.msrb.mxu3 %v1475_v9  ;;  %1622 = vmatpush.msra.mxu2 %v1475_v9 }
 0x5f9   :  { %v1446_v49 = vsel %vm855_vm14, %v1252_v41, %v1986_v38 }
 0x5fa   :  { %v1450_v54 = vsel %vm858_vm15, %v1446_v49, %v1991_v50 }
 0x5fd   :  { %v1999_v43 = vpop.permute.xlu0 %1998  ;;  %v2014_v39 = vld [vmem:[%s2886_s20] ss:$0 sm:$0xff] }
 0x5fe   :  { %v1247_v61 = vpop.f32.mrf.mxu1  ;;  %v2000_v32 = vunpack.i.l.bf16 %v1999_v43  ;;  %v2001_v53 = vunpack.i.h.bf16 %v1999_v43 }
 0x5ff   :  { %v1253_v44 = vmul.f32 %v1247_v61, %v1163_v30  ;;  %v1633_v30 = vpop.permute.xlu1 %1632 }
 0x600   :  { %v1449_v56 = vsel %vm858_vm15, %v1445_v25, %v2000_v32  ;;  %v1448_v57 = vsel %vm858_vm15, %v1444_v2, %v2001_v53 }
 0x601   :  { %v1447_v47 = vsel %vm855_vm14, %v1253_v44, %v1985_v42 }
 0x602   :  { %v1451_v10 = vsel %vm858_vm15, %v1447_v47, %v1990_v35 }
 0x603   :  { %1464 = vmatpush.msra.mxu0 %v1451_v10 }
 0x605   :  { %1465 = vmatpush.msra.mxu0 %v1450_v54 }
 0x606   :  { %v1507_v63 = vpop.f32.mrf.mxu1 }
 0x607   :  { %1466 = vmatpush.msra.mxu0 %v1449_v56  ;;  %v1508_v1 = vadd.f32 %v2012_v0, %v1507_v63  ;;  %v1635_v17 = vpop.permute.xlu1 %1634 }
 0x609   :  { %1467 = vmatpush.msra.mxu0 %v1448_v57  ;;  %v1513_v40 = vmax.f32 %v1508_v1, 0.0 }
 0x60a   :  { %1880 = vmatmul.msk.f32.vlgmr.msra.gmra.mxu0 %vm204_vm10, %v2554_v4 }
 0x60b   :  { %1541 = vmatpush.msrb.mxu0 %v1518_v58 }
 0x60d   :  { %1542 = vmatpush.msrb.mxu0 %v1517_v31 }
 0x60e   :  { %v1510_v4 = vpop.f32.mrf.mxu1 }
 0x60f   :  { %1543 = vmatpush.msrb.mxu0 %v1516_v59  ;;  %v1511_v5 = vadd.f32 %v2012_v0, %v1510_v4 }
 0x611   :  { %1544 = vmatpush.msrb.mxu0 %v1515_v62  ;;  %v1514_v6 = vmax.f32 %v1511_v5, 0.0 }
 0x612   :  { %1881 = vmatmul.msk.f32.gmra.mxu0 %vm204_vm10, %v2559_v11  ;;  %v1555_v11 = vld [vmem:[%s2884_s16 + $0x8] sm:$0xff] }
 0x613   :  { %1706 = vmatpush.msra.mxu0 %v1475_v9  ;;  %1582 = vmatpush.msra.mxu1 %v1555_v11 }
 0x615   :  { %1583 = vmatpush.msra.mxu1 %v1554_v14 }
 0x61a   :  { %1884 = vmatmul.msk.f32.vlgmr.msrb.gmra.mxu0 %vm204_vm10, %v1513_v40 }
 0x622   :  { %1885 = vmatmul.msk.f32.gmra.mxu0 %vm204_vm10, %v1514_v6 }
 0x687   :  { %v1469_v15 = vpop.f32.mrf.mxu0 }
 0x688   :  { %v1638_v16 = vsel %vm855_vm14, %v1633_v30, %v1469_v15  ;;  %1593 = vrot.lane.b32.xlu1 %v1469_v15, %s2124_s29  ;;  %1677 = vrot.lane.b32.xlu0 %v1469_v15, %s2122_s5 }
 0x689   :  { %1890 = vmatmul.msk.f32.vlgmr.msrb.gmra.mxu3 %vm858_vm15, %v1638_v16 }
 0x68f   :  { %v1472_v18 = vpop.f32.mrf.mxu0 }
 0x690   :  { %1595 = vrot.lane.b32.xlu2 %v1472_v18, %s2124_s29  ;;  %1679 = vrot.lane.b32.xlu0 %v1472_v18, %s2122_s5  ;;  %v1639_v26 = vsel %vm855_vm14, %v1635_v17, %v1472_v18 }
 0x691   :  { %1891 = vmatmul.msk.f32.gmra.mxu3 %vm858_vm15, %v1639_v26 }
 0x697   :  { %v1546_v60 = vpop.f32.mrf.mxu0 }
 0x698   :  { %v1547_v20 = vadd.f32 %v2013_v19, %v1546_v60 }
 0x69a   :  { %v1552_v21 = vmax.f32 %v1547_v20, 0.0 }
 0x69c   :  { %1886 = vmatmul.msk.f32.vlgmr.msra.gmra.mxu1 %vm204_vm10, %v1552_v21 }
 0x69f   :  { %v1549_v22 = vpop.f32.mrf.mxu0 }
 0x6a0   :  { %v1550_v23 = vadd.f32 %v2013_v19, %v1549_v22 }
 0x6a2   :  { %v1553_v24 = vmax.f32 %v1550_v23, 0.0 }
 0x6a4   :  { %1887 = vmatmul.msk.f32.gmra.mxu1 %vm204_vm10, %v1553_v24 }
 0x6ea   :  { %v1596_v37 = vpop.permute.xlu2 %1595 }
 0x6eb   :  { %v1600_v33 = vsel %vm855_vm14, %v2758_v34, %v1596_v37 }
 0x6fa   :  { %v1594_v28 = vpop.permute.xlu1 %1593  ;;  %v1678_v36 = vpop.permute.xlu0 %1677 }
 0x6fb   :  { %v1599_v3 = vsel %vm855_vm14, %v2747_v12, %v1594_v28  ;;  %v1683_v48 = vsel %vm855_vm14, %v1672_v29, %v1678_v36 }
 0x6fc   :  { %1888 = vmatmul.msk.f32.vlgmr.msra.gmra.mxu2 %vm858_vm15, %v1599_v3  ;;  %1892 = vmatmul.msk.f32.vlgmr.msra.gmra.mxu0 %vm858_vm15, %v1683_v48 }
 0x702   :  { %v1680_v7 = vpop.permute.xlu0 %1679 }
 0x703   :  { %v1684_v38 = vsel %vm855_vm14, %v1674_v27, %v1680_v7 }
 0x704   :  { %1889 = vmatmul.msk.f32.gmra.mxu2 %vm858_vm15, %v1600_v33  ;;  %1893 = vmatmul.msk.f32.gmra.mxu0 %vm858_vm15, %v1684_v38 }
 0x70c   :  { %v1663_v12 = vpop.f32.mrf.mxu3 }
 0x714   :  { %v1666_v46 = vpop.f32.mrf.mxu3 }
 0x719   :  { %v1585_v41 = vpop.f32.mrf.mxu1 }
 0x71a   :  { %v1586_v61 = vadd.f32 %v2014_v39, %v1585_v41 }
 0x71c   :  { %v1669_v42 = vmul.f32 %v1663_v12, %v1586_v61 }
 0x71e   :  { %1718 = vrot.lane.b32.xlu0 %v1669_v42, %s2124_s29 }
 0x721   :  { %v1588_v43 = vpop.f32.mrf.mxu1 }
 0x722   :  { %v1589_v44 = vadd.f32 %v2014_v39, %v1588_v43 }
 0x724   :  { %v1670_v34 = vmul.f32 %v1666_v46, %v1589_v44 }
 0x726   :  { %1720 = vrot.lane.b32.xlu1 %v1670_v34, %s2124_s29 }
 0x779   :  { %v1708_v35 = vpop.f32.mrf.mxu0 }
 0x77a   :  { %v1714_v8 = vmul.f32 %v1708_v35, %v1586_v61 }
 0x77c   :  { %1726 = vrot.lane.b32.xlu2 %v1714_v8, %s2125_s3 }
 0x77d   :  { %2045 = shalt.err (!%p2042_p4)
}
 0x77e   :  { %s2128_s0 = smov 128   ;;  %s2129_s4 = smov [#allocation2]  }
 0x77f   :  { %1763 = dma.vmem_to_hbm [thread:$0]  %s1756_s23, 256, %s1758_s26, [#allocation5], %s2128_s0, %s2128_s0, %s2125_s3   ;;  %v1624_v50 = vpop.f32.mrf.mxu2 }
 0x780   :  { %v1630_v10 = vmul.f32 %v1624_v50, %v1586_v61  ;;  %s1742_s9 = sshll.u32 %s2129_s4, 4  ;;  %s1744_s5 = sshll.u32 %s2298_s27, 4  ;;  %s1743_s9 = int_to_ptr.vmem [resolvable:$true] %s1742_s9  ;;  %s1745_s5 = int_to_ptr.hbm [resolvable:$true] %s1744_s5 }
 0x781   :  { %v1711_v47 = vpop.f32.mrf.mxu0  ;;  %s2058_s25 = sshra.s32 %s1745_s5, 4  ;;  %s2062_s8 = scalar_lea.hbm %s2298_s27, 16  ;;  %s2059_s25 = int_to_ptr.hbm [resolvable:$true] %s2058_s25 }
 0x782   :  { %v1715_v49 = vmul.f32 %v1711_v47, %v1589_v44  ;;  %s2060_s29 = scalar_lea.hbm %s2059_s25, 16  ;;  %p2063_p6 = scmp.lt.s32.totalorder %s2059_s25, %s2298_s27 }
 0x783   :  { %p2061_p5 = scmp.ne.s32.totalorder %s2059_s25, %s2060_s29  ;;  %p2064_p7 = scmp.lt.s32.totalorder %s2062_s8, %s2060_s29 }
 0x784   :  { %1728 = vrot.lane.b32.xlu0 %v1715_v49, %s2125_s3 }
 0x785   :  { %p2065_p8 = por %p2064_p7, %p2063_p6 }
 0x787   :  { %v1627_v54 = vpop.f32.mrf.mxu2  ;;  %p2066_p9 = pnand %p2065_p8, %p2061_p5 }
 0x788   :  { %v1631_v25 = vmul.f32 %v1627_v54, %v1589_v44 }
 0x790   :  { %v1719_v32 = vpop.permute.xlu0 %1718 }
 0x791   :  { %v1732_v51 = vsel %vm855_vm14, %v1630_v10, %v1719_v32 }
 0x798   :  { %v1721_v55 = vpop.permute.xlu1 %1720 }
 0x799   :  { %v1733_v56 = vsel %vm855_vm14, %v1631_v25, %v1721_v55 }
 0x7d6   :  { %v1727_v52 = vpop.permute.xlu2 %1726 }
 0x7d7   :  { %v1734_v53 = vsel %vm858_vm15, %v1732_v51, %v1727_v52 }
 0x7d8   :  { %1736 = vst.msk [vmem:[#allocation2] sm:$0xff] %vm861_vm0, %v1734_v53 }
 0x7f6   :  { %v1729_v2 = vpop.permute.xlu0 %1728 }
 0x7f7   :  { %v1735_v57 = vsel %vm858_vm15, %v1733_v56, %v1729_v2 }
 0x7f8   :  { %1737 = vst.msk [vmem:[#allocation2 + $0x8] sm:$0xff] %vm861_vm0, %v1735_v57 }
 0x7f9   :  { %2069 = shalt.err (!%p2066_p9)
}
 0x7fa   :  { %1750 = dma.vmem_to_hbm [thread:$0]  %s1743_s9, 256, %s1745_s5, [#allocation3], %s2128_s0, %s2128_s0, %s2125_s3  }
 0x7fb   :  { %2070 = dma.done.wait [#allocation3], 256  }
 0x7fc   :  { %2071 = vsyncadd [#allocation3], 4294967040 }
 0x7fd   :  { %2072 = dma.done.wait [#allocation5], 256  }
 0x7fe   :  { %2073 = vsyncadd [#allocation5], 4294967040 }
 0x7ff   :  { %1772 = vsyncpa [#allocation3], 1 }
 0x800   :  { %1773 = vsyncpa [#allocation5], 1 }

</bundles_post_ra>
